<compile_context>
chip_gen: v5e
topology: v5e:2x2
jax: 0.10.0
libtpu: 0.0.40
codegen_flags: <defaults>
</compile_context>

<pallas_src>
import functools
import math

import jax
import jax.numpy as jnp
from jax.experimental import pallas as pl
from jax.experimental.pallas import tpu as pltpu


# --------------------------------------------------------------------------- helpers
_VMEM_LIMIT_CACHE = None


def _vmem_limit_bytes():
    """Scoped-VMEM limit: ~3/4 of physical, capped at 96 MiB.

    -> ~96 MiB on 128-MiB parts (v5e / v6e), 48 MiB on 64-MiB v7x parts.
    """
    global _VMEM_LIMIT_CACHE
    if _VMEM_LIMIT_CACHE is None:
        try:
            cap = int(getattr(pltpu.get_tpu_info(), "vmem_capacity_bytes", 0))
        except Exception:
            cap = 0
        if cap <= 0:
            cap = 64 * 1024 * 1024  # conservative fallback (v7x physical size)
        _VMEM_LIMIT_CACHE = int(min(96 * 1024 * 1024, (cap * 3) // 4))
    return _VMEM_LIMIT_CACHE


def _compiler_params(dimension_semantics):
    return pltpu.CompilerParams(
        dimension_semantics=tuple(dimension_semantics),
        vmem_limit_bytes=_vmem_limit_bytes(),
    )


def _probe_single_buffering():
    """Feature-probe pl.Buffered(1) on constant-index blocks (halves the VMEM footprint
    of resident weight blocks). Runs a tiny kernel once at import; falls back cleanly."""
    if not hasattr(pl, "Buffered"):
        return False

    def probe(x_ref, w_ref, o_ref):
        o_ref[...] = x_ref[...] + w_ref[...]

    try:
        fn = pl.pallas_call(
            probe,
            out_shape=jax.ShapeDtypeStruct((16, 128), jnp.float32),
            grid=(2,),
            in_specs=[
                pl.BlockSpec((8, 128), lambda i: (i, 0)),
                pl.BlockSpec((8, 128), lambda i: (0, 0),
                             pipeline_mode=pl.Buffered(buffer_count=1)),
            ],
            out_specs=pl.BlockSpec((8, 128), lambda i: (i, 0)),
        )
        jax.block_until_ready(fn(jnp.ones((16, 128), jnp.float32),
                                 jnp.ones((8, 128), jnp.float32)))
        return True
    except Exception:
        return False


_SINGLE_BUFFER_WEIGHTS = _probe_single_buffering()


def _const_spec(shape):
    """BlockSpec for a block whose index never changes (weights / biases / LN params).
    Single-buffered when supported: these blocks are DMA'd once, so a second buffer
    only wastes VMEM."""
    index_map = lambda *_: (0,) * len(shape)
    if _SINGLE_BUFFER_WEIGHTS:
        return pl.BlockSpec(shape, index_map,
                            pipeline_mode=pl.Buffered(buffer_count=1))
    return pl.BlockSpec(shape, index_map)


def _pick_row_tile(n_rows, per_row_elems, resident_elems, max_tile=1024):
    """Largest row tile whose f32 working set (per-row bytes including double buffering
    plus the VMEM-resident weight blocks) fits ~3/4 of the scoped VMEM limit."""
    budget = (_vmem_limit_bytes() * 3) // 4
    avail = max(budget - 4 * resident_elems, 0)
    fit = avail // (4 * max(per_row_elems, 1))
    tile = int(min(max_tile, max(fit, 8), n_rows))
    if tile >= n_rows:
        return int(n_rows)                    # block == full dim: always layout-legal
    if tile >= 256:
        return (tile // 256) * 256            # MXU-friendly (256 on v6e/v7x)
    return max((tile // 8) * 8, 8)


def _pick_chunk(dim, candidates=(512, 256, 128)):
    """Largest MXU-friendly chunk that divides `dim` (else the full dim)."""
    for c in candidates:
        if dim % c == 0:
            return c
    return int(dim)


def _gelu_tanh(x):
    # TODO(synk): PyTorch F.gelu default is the exact erf form; tanh approximation
    # (max abs deviation ~1e-3) is used to stay on Mosaic-friendly EUP ops.
    c = math.sqrt(2.0 / math.pi)
    return 0.5 * x * (1.0 + jnp.tanh(c * (x + 0.044715 * x * x * x)))


# ----------------------------------------------------------------------------
# Kernel 1: fused Q/K/V projections (one launch; Q pre-scaled by 1/sqrt(Dh)).
# ----------------------------------------------------------------------------
def _qkv_proj_kernel(q_ref, k_ref, v_ref, wq_ref, wk_ref, wv_ref,
                     bq_ref, bk_ref, bv_ref, qo_ref, ko_ref, vo_ref, *, q_scale):
    # MXU operands keep their native dtype; accumulation is f32.
    qo_ref[...] = ((jnp.dot(q_ref[...], wq_ref[...], preferred_element_type=jnp.float32)
                    + bq_ref[...]) * q_scale).astype(qo_ref.dtype)
    ko_ref[...] = (jnp.dot(k_ref[...], wk_ref[...], preferred_element_type=jnp.float32)
                   + bk_ref[...]).astype(ko_ref.dtype)
    vo_ref[...] = (jnp.dot(v_ref[...], wv_ref[...], preferred_element_type=jnp.float32)
                   + bv_ref[...]).astype(vo_ref.dtype)


def qkv_projection(q2d, k2d, v2d, wq, bq, wk, bk, wv, bv, *, q_scale):
    """Single launch for all three projections.

    (If query is key is value, wq|wk|wv could further be concatenated into one (E, 3E)
    matmul; the module signature allows independent q/k/v tensors, so we fuse at the
    launch level and keep all weights VMEM-resident instead.)
    """
    R, E = q2d.shape
    tm = _pick_row_tile(R,
                        per_row_elems=12 * E,          # 3 in + 3 out rows, x2 buffers
                        resident_elems=3 * E * E + 3 * E)
    row_spec = pl.BlockSpec((tm, E), lambda i: (i, 0))
    out_struct = jax.ShapeDtypeStruct((R, E), q2d.dtype)
    return pl.pallas_call(
        functools.partial(_qkv_proj_kernel, q_scale=q_scale),
        out_shape=[out_struct, out_struct, out_struct],
        grid_spec=pltpu.PrefetchScalarGridSpec(
            num_scalar_prefetch=0,
            grid=(pl.cdiv(R, tm),),
            in_specs=[row_spec, row_spec, row_spec,
                      _const_spec((E, E)), _const_spec((E, E)), _const_spec((E, E)),
                      _const_spec((1, E)), _const_spec((1, E)), _const_spec((1, E))],
            out_specs=[row_spec, row_spec, row_spec],
        ),
        compiler_params=_compiler_params(("parallel",)),
    )(q2d, k2d, v2d, wq, wk, wv,
      bq.reshape(1, E), bk.reshape(1, E), bv.reshape(1, E))


# ----------------------------------------------------------------------------
# Kernel 2: flash-style attention + out-projection + residual + LayerNorm1.
# Grid (B, q-tiles, kv-tiles); kv axis is an 'arbitrary' reduction with online softmax.
# ----------------------------------------------------------------------------
def _attn_outproj_ln_kernel(q_ref, k_ref, v_ref, res_ref, wo_ref, bo_ref, g_ref, bt_ref,
                            o_ref, m_scr, l_scr, acc_scr, *, num_heads, head_dim, eps):
    ki = pl.program_id(2)

    @pl.when(ki == 0)
    def _init():
        m_scr[...] = jnp.full(m_scr.shape, -jnp.inf, m_scr.dtype)
        l_scr[...] = jnp.zeros(l_scr.shape, l_scr.dtype)
        acc_scr[...] = jnp.zeros(acc_scr.shape, acc_scr.dtype)

    q = q_ref[0]          # (tq, E) -- Q already scaled by 1/sqrt(Dh) in kernel 1
    k = k_ref[0]          # (tk, E)
    v = v_ref[0]          # (tk, E)

    # Heads live as Dh-wide lane slices of the (., E) blocks: no host-side transposes.
    for h in range(num_heads):
        lo, hi = h * head_dim, (h + 1) * head_dim
        s = jax.lax.dot_general(q[:, lo:hi], k[:, lo:hi],
                                (((1,), (1,)), ((), ())),
                                preferred_element_type=jnp.float32)       # (tq, tk)
        m_prev = m_scr[h]
        m_new = jnp.maximum(m_prev, jnp.max(s, axis=-1, keepdims=True))
        alpha = jnp.exp(m_prev - m_new)
        p = jnp.exp(s - m_new)
        l_scr[h] = alpha * l_scr[h] + jnp.sum(p, axis=-1, keepdims=True)
        acc_scr[h] = alpha * acc_scr[h] + jnp.dot(
            p.astype(v.dtype), v[:, lo:hi], preferred_element_type=jnp.float32)
        m_scr[h] = m_new

    # TODO(synk): attention-weight dropout (p=0.1) is identity in eval mode.
    @pl.when(ki == pl.num_programs(2) - 1)
    def _finalize():
        # Out-projection decomposed over heads: concat_h(ctx_h) @ Wo == sum_h ctx_h @ Wo[h].
        y = jnp.zeros(o_ref.shape[1:], jnp.float32)
        for h in range(num_heads):
            lo, hi = h * head_dim, (h + 1) * head_dim
            ctx_h = acc_scr[h] * pl.reciprocal(l_scr[h], approx=True)     # (tq, Dh)
            y = y + jnp.dot(ctx_h.astype(wo_ref.dtype), wo_ref[lo:hi, :],
                            preferred_element_type=jnp.float32)
        # Residual (= original query block) + LayerNorm, all before a single store.
        # TODO(synk): residual dropout (p=0.1) is identity in eval mode.
        z = y + bo_ref[...] + res_ref[0].astype(jnp.float32)
        mu = jnp.mean(z, axis=-1, keepdims=True)
        zc = z - mu
        var = jnp.mean(zc * zc, axis=-1, keepdims=True)
        zn = zc * jax.lax.rsqrt(var + eps)
        o_ref[0] = (zn * g_ref[...] + bt_ref[...]).astype(o_ref.dtype)


def attention_outproj_layernorm(qp, kp, vp, residual, wo, bo, gamma, beta,
                                *, num_heads, eps=1e-5):
    B, S, E = qp.shape
    Dh = E // num_heads
    # Sequence tiling bounds VMEM to O(tq*tk + tq*E) regardless of S. The q-tile grid
    # axis also gives megacore parallelism (supersedes a plain (B, H) grid, since the
    # fused out-projection needs all heads of a row tile together).
    tq = _pick_chunk(S, candidates=(256, 128))
    tk = tq
    q_spec = pl.BlockSpec((1, tq, E), lambda b, qi, ki: (b, qi, 0))
    kv_spec = pl.BlockSpec((1, tk, E), lambda b, qi, ki: (b, ki, 0))
    return pl.pallas_call(
        functools.partial(_attn_outproj_ln_kernel,
                          num_heads=num_heads, head_dim=Dh, eps=eps),
        out_shape=jax.ShapeDtypeStruct((B, S, E), qp.dtype),
        grid_spec=pltpu.PrefetchScalarGridSpec(
            num_scalar_prefetch=0,
            grid=(B, S // tq, S // tk),
            in_specs=[q_spec, kv_spec, kv_spec, q_spec,
                      _const_spec((E, E)), _const_spec((1, E)),
                      _const_spec((1, E)), _const_spec((1, E))],
            out_specs=q_spec,
            scratch_shapes=[pltpu.VMEM((num_heads, tq, 1), jnp.float32),
                            pltpu.VMEM((num_heads, tq, 1), jnp.float32),
                            pltpu.VMEM((num_heads, tq, Dh), jnp.float32)],
        ),
        compiler_params=_compiler_params(("parallel", "parallel", "arbitrary")),
    )(qp, kp, vp, residual, wo,
      bo.reshape(1, E), gamma.reshape(1, E), beta.reshape(1, E))


# ----------------------------------------------------------------------------
# Kernel 3: FFN (linear -> GELU -> linear) + residual + LayerNorm2, with the hidden
# dimension chunked along an 'arbitrary' reduction axis (bounded weight residency).
# ----------------------------------------------------------------------------
def _ffn_add_ln_kernel(x_ref, w1_ref, b1_ref, w2_ref, b2_ref, g_ref, bt_ref,
                       o_ref, acc_ref, *, eps):
    j = pl.program_id(1)

    @pl.when(j == 0)
    def _init():
        acc_ref[...] = jnp.zeros(acc_ref.shape, acc_ref.dtype)

    x = x_ref[...]
    h = _gelu_tanh(jnp.dot(x, w1_ref[...], preferred_element_type=jnp.float32)
                   + b1_ref[...])
    # TODO(synk): FFN-internal dropout and residual dropout (p=0.1) are identity in eval mode.
    acc_ref[...] += jnp.dot(h.astype(w2_ref.dtype), w2_ref[...],
                            preferred_element_type=jnp.float32)

    @pl.when(j == pl.num_programs(1) - 1)
    def _finalize():
        z = acc_ref[...] + b2_ref[...] + x.astype(jnp.float32)   # residual = FFN input
        mu = jnp.mean(z, axis=-1, keepdims=True)
        zc = z - mu
        var = jnp.mean(zc * zc, axis=-1, keepdims=True)
        zn = zc * jax.lax.rsqrt(var + eps)
        o_ref[...] = (zn * g_ref[...] + bt_ref[...]).astype(o_ref.dtype)


def ffn_add_layernorm(x2d, w1, b1, w2, b2, gamma, beta, *, eps=1e-5):
    R, D = x2d.shape
    Hd = w1.shape[1]
    hc = _pick_chunk(Hd, candidates=(512, 256, 128))
    tm = _pick_row_tile(R,
                        per_row_elems=5 * D + hc,               # x/out (x2 buffers), acc, hidden
                        resident_elems=4 * D * hc + 2 * hc + 3 * D)
    row_spec = pl.BlockSpec((tm, D), lambda i, j: (i, 0))
    return pl.pallas_call(
        functools.partial(_ffn_add_ln_kernel, eps=eps),
        out_shape=jax.ShapeDtypeStruct((R, D), x2d.dtype),
        grid_spec=pltpu.PrefetchScalarGridSpec(
            num_scalar_prefetch=0,
            grid=(pl.cdiv(R, tm), Hd // hc),
            in_specs=[row_spec,
                      pl.BlockSpec((D, hc), lambda i, j: (0, j)),
                      pl.BlockSpec((1, hc), lambda i, j: (0, j)),
                      pl.BlockSpec((hc, D), lambda i, j: (j, 0)),
                      _const_spec((1, D)), _const_spec((1, D)), _const_spec((1, D))],
            out_specs=row_spec,
            scratch_shapes=[pltpu.VMEM((tm, D), jnp.float32)],
        ),
        compiler_params=_compiler_params(("parallel", "arbitrary")),
    )(x2d, w1, b1.reshape(1, Hd), w2, b2.reshape(1, D),
      gamma.reshape(1, D), beta.reshape(1, D))


# ----------------------------------------------------------------------------
# Full layer forward (eval mode; positional_encoding=False per constructor default).
# ----------------------------------------------------------------------------
def transformer_encoder_layer(query, key, value, params, *, num_heads, eps=1e-5):
    B, S, E = query.shape
    Dh = E // num_heads
    R = B * S

    q2d = query.reshape(R, E)
    k2d = key.reshape(R, E)
    v2d = value.reshape(R, E)

    qp, kp, vp = qkv_projection(q2d, k2d, v2d,
                                params["wq"], params["bq"],
                                params["wk"], params["bk"],
                                params["wv"], params["bv"],
                                q_scale=1.0 / math.sqrt(Dh))

    # (R, E) <-> (B, S, E) reshapes are free; there are no host-side transposes.
    x1 = attention_outproj_layernorm(
        qp.reshape(B, S, E), kp.reshape(B, S, E), vp.reshape(B, S, E), query,
        params["wo"], params["bo"], params["ln1_g"], params["ln1_b"],
        num_heads=num_heads, eps=eps)

    out = ffn_add_layernorm(x1.reshape(R, E),
                            params["w1"], params["b1"], params["w2"], params["b2"],
                            params["ln2_g"], params["ln2_b"], eps=eps)
    return out.reshape(B, S, E)


# ----------------------------------------------------------------------------
# Pure-JAX reference (same eval-mode semantics) for the correctness check.
# ----------------------------------------------------------------------------
def reference_layer(query, key, value, params, *, num_heads, eps=1e-5):
    B, S, E = query.shape
    H = num_heads
    Dh = E // H

    def lin(x, w, b):
        return x @ w + b

    def ln(z, g, b):
        mu = jnp.mean(z, axis=-1, keepdims=True)
        var = jnp.mean((z - mu) ** 2, axis=-1, keepdims=True)
        return (z - mu) * jax.lax.rsqrt(var + eps) * g + b

    def heads(x):
        return x.reshape(B, S, H, Dh).transpose(0, 2, 1, 3)

    qh = heads(lin(query, params["wq"], params["bq"]))
    kh = heads(lin(key, params["wk"], params["bk"]))
    vh = heads(lin(value, params["wv"], params["bv"]))
    s = jnp.einsum("bhqd,bhkd->bhqk", qh, kh) / math.sqrt(Dh)
    p = jax.nn.softmax(s, axis=-1)
    ctx = jnp.einsum("bhqk,bhkd->bhqd", p, vh).transpose(0, 2, 1, 3).reshape(B, S, E)
    attn_out = lin(ctx, params["wo"], params["bo"])
    x1 = ln(attn_out + query, params["ln1_g"], params["ln1_b"])
    h = _gelu_tanh(lin(x1, params["w1"], params["b1"]))
    ff = lin(h, params["w2"], params["b2"])
    return ln(ff + x1, params["ln2_g"], params["ln2_b"])


if __name__ == "__main__":
    B, S, E, H = 2, 8, 32, 4

    key0 = jax.random.PRNGKey(0)
    keys = jax.random.split(key0, 20)

    def normal(k, shape, scale=1.0):
        return scale * jax.random.normal(k, shape, dtype=jnp.float32)

    query = normal(keys[0], (B, S, E))
    key_in = normal(keys[1], (B, S, E))
    value = normal(keys[2], (B, S, E))

    s_in = 1.0 / math.sqrt(E)
    params = dict(
        wq=normal(keys[3], (E, E), s_in), bq=normal(keys[4], (E,), 0.1),
        wk=normal(keys[5], (E, E), s_in), bk=normal(keys[6], (E,), 0.1),
        wv=normal(keys[7], (E, E), s_in), bv=normal(keys[8], (E,), 0.1),
        wo=normal(keys[9], (E, E), s_in), bo=normal(keys[10], (E,), 0.1),
        w1=normal(keys[11], (E, E), s_in), b1=normal(keys[12], (E,), 0.1),
        w2=normal(keys[13], (E, E), s_in), b2=normal(keys[14], (E,), 0.1),
        ln1_g=1.0 + 0.1 * jax.random.normal(keys[15], (E,), dtype=jnp.float32),
        ln1_b=0.1 * jax.random.normal(keys[16], (E,), dtype=jnp.float32),
        ln2_g=1.0 + 0.1 * jax.random.normal(keys[17], (E,), dtype=jnp.float32),
        ln2_b=0.1 * jax.random.normal(keys[18], (E,), dtype=jnp.float32),
    )

    fwd = jax.jit(functools.partial(transformer_encoder_layer, num_heads=H))
    out = jax.block_until_ready(fwd(query, key_in, value, params))

    ref = reference_layer(query, key_in, value, params, num_heads=H)
    assert out.shape == (B, S, E)
    assert bool(jnp.all(jnp.isfinite(out)))
    max_err = float(jnp.max(jnp.abs(out - ref)))
    assert jnp.allclose(out, ref, atol=2e-2, rtol=2e-2), f"mismatch vs reference, max_err={max_err}"

    print("KERNEL_OK")
</pallas_src>

<mosaic_0001>
module attributes {stable_mosaic.version = 11 : i64} {
  func.func @probe(%arg0: i32, %arg1: memref<8x128xf32, #tpu.memory_space<vmem>>, %arg2: memref<8x128xf32, #tpu.memory_space<vmem>>, %arg3: memref<8x128xf32, #tpu.memory_space<vmem>>) attributes {dimension_semantics = [#tpu.dimension_semantics<arbitrary>], iteration_bounds = array<i64: 2>, scalar_prefetch = 0 : i64, scratch_operands = 0 : i64, tpu.core_type = #tpu.core_type<tc>, window_params = [{transform_indices = @transform_0, window_bounds = array<i64: 8, 128>}, {pipeline_mode = #tpu.pipeline_mode<synchronous>, transform_indices = @transform_1, window_bounds = array<i64: 8, 128>}, {transform_indices = @transform_2, window_bounds = array<i64: 8, 128>}]} {
    %c0 = arith.constant 0 : index
    %c0_0 = arith.constant 0 : index
    %0 = vector.load %arg1[%c0, %c0_0] : memref<8x128xf32, #tpu.memory_space<vmem>>, vector<8x128xf32>
    %c0_1 = arith.constant 0 : index
    %c0_2 = arith.constant 0 : index
    %1 = vector.load %arg2[%c0_1, %c0_2] : memref<8x128xf32, #tpu.memory_space<vmem>>, vector<8x128xf32>
    %2 = arith.addf %0, %1 : vector<8x128xf32>
    %c0_3 = arith.constant 0 : index
    %c0_4 = arith.constant 0 : index
    %3 = vector.load %arg3[%c0_3, %c0_4] : memref<8x128xf32, #tpu.memory_space<vmem>>, vector<8x128xf32>
    tpu.vector_store %arg3[%c0_3, %c0_4], %2 {strides = array<i32>} : memref<8x128xf32, #tpu.memory_space<vmem>>, vector<8x128xf32>,
    return
  }
  func.func @transform_0(%arg0: i32) -> (i32, i32) {
    %c0_i32 = arith.constant 0 : i32
    %c0_i32_0 = arith.constant 0 : i32
    return %arg0, %c0_i32 : i32, i32
  }
  func.func @transform_1(%arg0: i32) -> (i32, i32) {
    %c0_i32 = arith.constant 0 : i32
    %c0_i32_0 = arith.constant 0 : i32
    %c0_i32_1 = arith.constant 0 : i32
    return %c0_i32, %c0_i32_0 : i32, i32
  }
  func.func @transform_2(%arg0: i32) -> (i32, i32) {
    %c0_i32 = arith.constant 0 : i32
    %c0_i32_0 = arith.constant 0 : i32
    return %arg0, %c0_i32 : i32, i32
  }
}

module attributes {stable_mosaic.version = 11 : i64} {
  func.func @_ffn_add_ln_kernel(%arg0: i32, %arg1: i32, %arg2: memref<16x32xf32, #tpu.memory_space<vmem>>, %arg3: memref<32x32xf32, #tpu.memory_space<vmem>>, %arg4: memref<1x32xf32, #tpu.memory_space<vmem>>, %arg5: memref<32x32xf32, #tpu.memory_space<vmem>>, %arg6: memref<1x32xf32, #tpu.memory_space<vmem>>, %arg7: memref<1x32xf32, #tpu.memory_space<vmem>>, %arg8: memref<1x32xf32, #tpu.memory_space<vmem>>, %arg9: memref<16x32xf32, #tpu.memory_space<vmem>>, %arg10: memref<16x32xf32, #tpu.memory_space<vmem>>) attributes {dimension_semantics = [#tpu.dimension_semantics<parallel>, #tpu.dimension_semantics<arbitrary>], iteration_bounds = array<i64: 1, 1>, scalar_prefetch = 0 : i64, scratch_operands = 1 : i64, tpu.core_type = #tpu.core_type<tc>, window_params = [{transform_indices = @transform_0, window_bounds = array<i64: 16, 32>}, {transform_indices = @transform_1, window_bounds = array<i64: 32, 32>}, {transform_indices = @transform_2, window_bounds = array<i64: 1, 32>}, {transform_indices = @transform_3, window_bounds = array<i64: 32, 32>}, {pipeline_mode = #tpu.pipeline_mode<synchronous>, transform_indices = @transform_4, window_bounds = array<i64: 1, 32>}, {pipeline_mode = #tpu.pipeline_mode<synchronous>, transform_indices = @transform_5, window_bounds = array<i64: 1, 32>}, {pipeline_mode = #tpu.pipeline_mode<synchronous>, transform_indices = @transform_6, window_bounds = array<i64: 1, 32>}, {transform_indices = @transform_7, window_bounds = array<i64: 16, 32>}]} {
    %c0_i32 = arith.constant 0 : i32
    %0 = arith.cmpi eq, %arg1, %c0_i32 : i32
    %1 = arith.extui %0 : i1 to i32
    %c0_i32_0 = arith.constant 0 : i32
    %2 = arith.cmpi ne, %1, %c0_i32_0 : i32
    scf.if %2 {
      %cst_19 = arith.constant 0.000000e+00 : f32
      %30 = vector.broadcast %cst_19 : f32 to vector<16x32xf32>
      %c0_20 = arith.constant 0 : index
      %c0_21 = arith.constant 0 : index
      %31 = vector.load %arg10[%c0_20, %c0_21] : memref<16x32xf32, #tpu.memory_space<vmem>>, vector<16x32xf32>
      tpu.vector_store %arg10[%c0_20, %c0_21], %30 {strides = array<i32>} : memref<16x32xf32, #tpu.memory_space<vmem>>, vector<16x32xf32>,
    } else {
    }
    %c0 = arith.constant 0 : index
    %c0_1 = arith.constant 0 : index
    %3 = vector.load %arg2[%c0, %c0_1] : memref<16x32xf32, #tpu.memory_space<vmem>>, vector<16x32xf32>
    %c0_2 = arith.constant 0 : index
    %c0_3 = arith.constant 0 : index
    %4 = vector.load %arg3[%c0_2, %c0_3] : memref<32x32xf32, #tpu.memory_space<vmem>>, vector<32x32xf32>
    %cst = arith.constant dense<0.000000e+00> : vector<16x32xf32>
    %5 = tpu.matmul %3, %4, %cst {dimension_numbers = #tpu.dot_dimension_numbers<[1], [0], [0], [1], [0, 0, 1, 1], [], []>} : vector<16x32xf32>, vector<32x32xf32>, vector<16x32xf32> -> vector<16x32xf32>
    %c0_4 = arith.constant 0 : index
    %c0_5 = arith.constant 0 : index
    %6 = vector.load %arg4[%c0_4, %c0_5] : memref<1x32xf32, #tpu.memory_space<vmem>>, vector<1x32xf32>
    %7 = vector.broadcast %6 : vector<1x32xf32> to vector<16x32xf32>
    %8 = arith.addf %5, %7 : vector<16x32xf32>
    %cst_6 = arith.constant 5.000000e-01 : f32
    %9 = vector.broadcast %cst_6 : f32 to vector<16x32xf32>
    %10 = arith.mulf %9, %8 : vector<16x32xf32>
    %cst_7 = arith.constant 4.471500e-02 : f32
    %11 = vector.broadcast %cst_7 : f32 to vector<16x32xf32>
    %12 = arith.mulf %11, %8 : vector<16x32xf32>
    %13 = arith.mulf %12, %8 : vector<16x32xf32>
    %14 = arith.mulf %13, %8 : vector<16x32xf32>
    %15 = arith.addf %8, %14 : vector<16x32xf32>
    %cst_8 = arith.constant 0.797884583 : f32
    %16 = vector.broadcast %cst_8 : f32 to vector<16x32xf32>
    %17 = arith.mulf %16, %15 : vector<16x32xf32>
    %18 = math.tanh %17 : vector<16x32xf32>
    %cst_9 = arith.constant 1.000000e+00 : f32
    %19 = vector.broadcast %cst_9 : f32 to vector<16x32xf32>
    %20 = arith.addf %19, %18 : vector<16x32xf32>
    %21 = arith.mulf %10, %20 : vector<16x32xf32>
    %c0_10 = arith.constant 0 : index
    %c0_11 = arith.constant 0 : index
    %22 = vector.load %arg10[%c0_10, %c0_11] : memref<16x32xf32, #tpu.memory_space<vmem>>, vector<16x32xf32>
    %c0_12 = arith.constant 0 : index
    %c0_13 = arith.constant 0 : index
    %23 = vector.load %arg5[%c0_12, %c0_13] : memref<32x32xf32, #tpu.memory_space<vmem>>, vector<32x32xf32>
    %cst_14 = arith.constant dense<0.000000e+00> : vector<16x32xf32>
    %24 = tpu.matmul %21, %23, %cst_14 {dimension_numbers = #tpu.dot_dimension_numbers<[1], [0], [0], [1], [0, 0, 1, 1], [], []>} : vector<16x32xf32>, vector<32x32xf32>, vector<16x32xf32> -> vector<16x32xf32>
    %25 = arith.addf %22, %24 : vector<16x32xf32>
    %c0_15 = arith.constant 0 : index
    %c0_16 = arith.constant 0 : index
    %26 = vector.load %arg10[%c0_15, %c0_16] : memref<16x32xf32, #tpu.memory_space<vmem>>, vector<16x32xf32>
    tpu.vector_store %arg10[%c0_15, %c0_16], %25 {strides = array<i32>} : memref<16x32xf32, #tpu.memory_space<vmem>>, vector<16x32xf32>,
    %c0_i32_17 = arith.constant 0 : i32
    %27 = arith.cmpi eq, %arg1, %c0_i32_17 : i32
    %28 = arith.extui %27 : i1 to i32
    %c0_i32_18 = arith.constant 0 : i32
    %29 = arith.cmpi ne, %28, %c0_i32_18 : i32
    scf.if %29 {
      %c0_19 = arith.constant 0 : index
      %c0_20 = arith.constant 0 : index
      %30 = vector.load %arg10[%c0_19, %c0_20] : memref<16x32xf32, #tpu.memory_space<vmem>>, vector<16x32xf32>
      %c0_21 = arith.constant 0 : index
      %c0_22 = arith.constant 0 : index
      %31 = vector.load %arg6[%c0_21, %c0_22] : memref<1x32xf32, #tpu.memory_space<vmem>>, vector<1x32xf32>
      %32 = vector.broadcast %31 : vector<1x32xf32> to vector<16x32xf32>
      %33 = arith.addf %30, %32 : vector<16x32xf32>
      %34 = arith.addf %33, %3 : vector<16x32xf32>
      %cst_23 = arith.constant dense<0.000000e+00> : vector<16xf32>
      %35 = vector.multi_reduction <add>, %34, %cst_23 [1] : vector<16x32xf32> to vector<16xf32>
      %36 = vector.shape_cast %35 : vector<16xf32> to vector<16x1xf32>
      %cst_24 = arith.constant 3.200000e+01 : f32
      %37 = vector.broadcast %cst_24 : f32 to vector<16x1xf32>
      %38 = arith.divf %36, %37 : vector<16x1xf32>
      %39 = vector.broadcast %38 : vector<16x1xf32> to vector<16x32xf32>
      %40 = arith.subf %34, %39 : vector<16x32xf32>
      %41 = arith.mulf %40, %40 : vector<16x32xf32>
      %cst_25 = arith.constant dense<0.000000e+00> : vector<16xf32>
      %42 = vector.multi_reduction <add>, %41, %cst_25 [1] : vector<16x32xf32> to vector<16xf32>
      %43 = vector.shape_cast %42 : vector<16xf32> to vector<16x1xf32>
      %cst_26 = arith.constant 3.200000e+01 : f32
      %44 = vector.broadcast %cst_26 : f32 to vector<16x1xf32>
      %45 = arith.divf %43, %44 : vector<16x1xf32>
      %cst_27 = arith.constant 9.99999974E-6 : f32
      %46 = vector.broadcast %cst_27 : f32 to vector<16x1xf32>
      %47 = arith.addf %45, %46 : vector<16x1xf32>
      %48 = math.rsqrt %47 : vector<16x1xf32>
      %49 = vector.broadcast %48 : vector<16x1xf32> to vector<16x32xf32>
      %50 = arith.mulf %40, %49 : vector<16x32xf32>
      %c0_28 = arith.constant 0 : index
      %c0_29 = arith.constant 0 : index
      %51 = vector.load %arg7[%c0_28, %c0_29] : memref<1x32xf32, #tpu.memory_space<vmem>>, vector<1x32xf32>
      %52 = vector.broadcast %51 : vector<1x32xf32> to vector<16x32xf32>
      %53 = arith.mulf %50, %52 : vector<16x32xf32>
      %c0_30 = arith.constant 0 : index
      %c0_31 = arith.constant 0 : index
      %54 = vector.load %arg8[%c0_30, %c0_31] : memref<1x32xf32, #tpu.memory_space<vmem>>, vector<1x32xf32>
      %55 = vector.broadcast %54 : vector<1x32xf32> to vector<16x32xf32>
      %56 = arith.addf %53, %55 : vector<16x32xf32>
      %c0_32 = arith.constant 0 : index
      %c0_33 = arith.constant 0 : index
      %57 = vector.load %arg9[%c0_32, %c0_33] : memref<16x32xf32, #tpu.memory_space<vmem>>, vector<16x32xf32>
      tpu.vector_store %arg9[%c0_32, %c0_33], %56 {strides = array<i32>} : memref<16x32xf32, #tpu.memory_space<vmem>>, vector<16x32xf32>,
    } else {
    }
    return
  }
  func.func @transform_0(%arg0: i32, %arg1: i32) -> (i32, i32) {
    %c0_i32 = arith.constant 0 : i32
    %c0_i32_0 = arith.constant 0 : i32
    return %arg0, %c0_i32 : i32, i32
  }
  func.func @transform_1(%arg0: i32, %arg1: i32) -> (i32, i32) {
    %c0_i32 = arith.constant 0 : i32
    %c0_i32_0 = arith.constant 0 : i32
    return %c0_i32, %arg1 : i32, i32
  }
  func.func @transform_2(%arg0: i32, %arg1: i32) -> (i32, i32) {
    %c0_i32 = arith.constant 0 : i32
    %c0_i32_0 = arith.constant 0 : i32
    return %c0_i32, %arg1 : i32, i32
  }
  func.func @transform_3(%arg0: i32, %arg1: i32) -> (i32, i32) {
    %c0_i32 = arith.constant 0 : i32
    %c0_i32_0 = arith.constant 0 : i32
    return %arg1, %c0_i32 : i32, i32
  }
  func.func @transform_4(%arg0: i32, %arg1: i32) -> (i32, i32) {
    %c0_i32 = arith.constant 0 : i32
    %c0_i32_0 = arith.constant 0 : i32
    %c0_i32_1 = arith.constant 0 : i32
    return %c0_i32, %c0_i32_0 : i32, i32
  }
  func.func @transform_5(%arg0: i32, %arg1: i32) -> (i32, i32) {
    %c0_i32 = arith.constant 0 : i32
    %c0_i32_0 = arith.constant 0 : i32
    %c0_i32_1 = arith.constant 0 : i32
    return %c0_i32, %c0_i32_0 : i32, i32
  }
  func.func @transform_6(%arg0: i32, %arg1: i32) -> (i32, i32) {
    %c0_i32 = arith.constant 0 : i32
    %c0_i32_0 = arith.constant 0 : i32
    %c0_i32_1 = arith.constant 0 : i32
    return %c0_i32, %c0_i32_0 : i32, i32
  }
  func.func @transform_7(%arg0: i32, %arg1: i32) -> (i32, i32) {
    %c0_i32 = arith.constant 0 : i32
    %c0_i32_0 = arith.constant 0 : i32
    return %arg0, %c0_i32 : i32, i32
  }
}

module attributes {stable_mosaic.version = 11 : i64} {
  func.func @_qkv_proj_kernel(%arg0: i32, %arg1: memref<16x32xf32, #tpu.memory_space<vmem>>, %arg2: memref<16x32xf32, #tpu.memory_space<vmem>>, %arg3: memref<16x32xf32, #tpu.memory_space<vmem>>, %arg4: memref<32x32xf32, #tpu.memory_space<vmem>>, %arg5: memref<32x32xf32, #tpu.memory_space<vmem>>, %arg6: memref<32x32xf32, #tpu.memory_space<vmem>>, %arg7: memref<1x32xf32, #tpu.memory_space<vmem>>, %arg8: memref<1x32xf32, #tpu.memory_space<vmem>>, %arg9: memref<1x32xf32, #tpu.memory_space<vmem>>, %arg10: memref<16x32xf32, #tpu.memory_space<vmem>>, %arg11: memref<16x32xf32, #tpu.memory_space<vmem>>, %arg12: memref<16x32xf32, #tpu.memory_space<vmem>>) attributes {dimension_semantics = [#tpu.dimension_semantics<parallel>], iteration_bounds = array<i64: 1>, scalar_prefetch = 0 : i64, scratch_operands = 0 : i64, tpu.core_type = #tpu.core_type<tc>, window_params = [{transform_indices = @transform_0, window_bounds = array<i64: 16, 32>}, {transform_indices = @transform_1, window_bounds = array<i64: 16, 32>}, {transform_indices = @transform_2, window_bounds = array<i64: 16, 32>}, {pipeline_mode = #tpu.pipeline_mode<synchronous>, transform_indices = @transform_3, window_bounds = array<i64: 32, 32>}, {pipeline_mode = #tpu.pipeline_mode<synchronous>, transform_indices = @transform_4, window_bounds = array<i64: 32, 32>}, {pipeline_mode = #tpu.pipeline_mode<synchronous>, transform_indices = @transform_5, window_bounds = array<i64: 32, 32>}, {pipeline_mode = #tpu.pipeline_mode<synchronous>, transform_indices = @transform_6, window_bounds = array<i64: 1, 32>}, {pipeline_mode = #tpu.pipeline_mode<synchronous>, transform_indices = @transform_7, window_bounds = array<i64: 1, 32>}, {pipeline_mode = #tpu.pipeline_mode<synchronous>, transform_indices = @transform_8, window_bounds = array<i64: 1, 32>}, {transform_indices = @transform_9, window_bounds = array<i64: 16, 32>}, {transform_indices = @transform_10, window_bounds = array<i64: 16, 32>}, {transform_indices = @transform_11, window_bounds = array<i64: 16, 32>}]} {
    %c0 = arith.constant 0 : index
    %c0_0 = arith.constant 0 : index
    %0 = vector.load %arg1[%c0, %c0_0] : memref<16x32xf32, #tpu.memory_space<vmem>>, vector<16x32xf32>
    %c0_1 = arith.constant 0 : index
    %c0_2 = arith.constant 0 : index
    %1 = vector.load %arg4[%c0_1, %c0_2] : memref<32x32xf32, #tpu.memory_space<vmem>>, vector<32x32xf32>
    %cst = arith.constant dense<0.000000e+00> : vector<16x32xf32>
    %2 = tpu.matmul %0, %1, %cst {dimension_numbers = #tpu.dot_dimension_numbers<[1], [0], [0], [1], [0, 0, 1, 1], [], []>} : vector<16x32xf32>, vector<32x32xf32>, vector<16x32xf32> -> vector<16x32xf32>
    %c0_3 = arith.constant 0 : index
    %c0_4 = arith.constant 0 : index
    %3 = vector.load %arg7[%c0_3, %c0_4] : memref<1x32xf32, #tpu.memory_space<vmem>>, vector<1x32xf32>
    %4 = vector.broadcast %3 : vector<1x32xf32> to vector<16x32xf32>
    %5 = arith.addf %2, %4 : vector<16x32xf32>
    %cst_5 = arith.constant 0.353553385 : f32
    %6 = vector.broadcast %cst_5 : f32 to vector<16x32xf32>
    %7 = arith.mulf %5, %6 : vector<16x32xf32>
    %c0_6 = arith.constant 0 : index
    %c0_7 = arith.constant 0 : index
    %8 = vector.load %arg10[%c0_6, %c0_7] : memref<16x32xf32, #tpu.memory_space<vmem>>, vector<16x32xf32>
    tpu.vector_store %arg10[%c0_6, %c0_7], %7 {strides = array<i32>} : memref<16x32xf32, #tpu.memory_space<vmem>>, vector<16x32xf32>,
    %c0_8 = arith.constant 0 : index
    %c0_9 = arith.constant 0 : index
    %9 = vector.load %arg2[%c0_8, %c0_9] : memref<16x32xf32, #tpu.memory_space<vmem>>, vector<16x32xf32>
    %c0_10 = arith.constant 0 : index
    %c0_11 = arith.constant 0 : index
    %10 = vector.load %arg5[%c0_10, %c0_11] : memref<32x32xf32, #tpu.memory_space<vmem>>, vector<32x32xf32>
    %cst_12 = arith.constant dense<0.000000e+00> : vector<16x32xf32>
    %11 = tpu.matmul %9, %10, %cst_12 {dimension_numbers = #tpu.dot_dimension_numbers<[1], [0], [0], [1], [0, 0, 1, 1], [], []>} : vector<16x32xf32>, vector<32x32xf32>, vector<16x32xf32> -> vector<16x32xf32>
    %c0_13 = arith.constant 0 : index
    %c0_14 = arith.constant 0 : index
    %12 = vector.load %arg8[%c0_13, %c0_14] : memref<1x32xf32, #tpu.memory_space<vmem>>, vector<1x32xf32>
    %13 = vector.broadcast %12 : vector<1x32xf32> to vector<16x32xf32>
    %14 = arith.addf %11, %13 : vector<16x32xf32>
    %c0_15 = arith.constant 0 : index
    %c0_16 = arith.constant 0 : index
    %15 = vector.load %arg11[%c0_15, %c0_16] : memref<16x32xf32, #tpu.memory_space<vmem>>, vector<16x32xf32>
    tpu.vector_store %arg11[%c0_15, %c0_16], %14 {strides = array<i32>} : memref<16x32xf32, #tpu.memory_space<vmem>>, vector<16x32xf32>,
    %c0_17 = arith.constant 0 : index
    %c0_18 = arith.constant 0 : index
    %16 = vector.load %arg3[%c0_17, %c0_18] : memref<16x32xf32, #tpu.memory_space<vmem>>, vector<16x32xf32>
    %c0_19 = arith.constant 0 : index
    %c0_20 = arith.constant 0 : index
    %17 = vector.load %arg6[%c0_19, %c0_20] : memref<32x32xf32, #tpu.memory_space<vmem>>, vector<32x32xf32>
    %cst_21 = arith.constant dense<0.000000e+00> : vector<16x32xf32>
    %18 = tpu.matmul %16, %17, %cst_21 {dimension_numbers = #tpu.dot_dimension_numbers<[1], [0], [0], [1], [0, 0, 1, 1], [], []>} : vector<16x32xf32>, vector<32x32xf32>, vector<16x32xf32> -> vector<16x32xf32>
    %c0_22 = arith.constant 0 : index
    %c0_23 = arith.constant 0 : index
    %19 = vector.load %arg9[%c0_22, %c0_23] : memref<1x32xf32, #tpu.memory_space<vmem>>, vector<1x32xf32>
    %20 = vector.broadcast %19 : vector<1x32xf32> to vector<16x32xf32>
    %21 = arith.addf %18, %20 : vector<16x32xf32>
    %c0_24 = arith.constant 0 : index
    %c0_25 = arith.constant 0 : index
    %22 = vector.load %arg12[%c0_24, %c0_25] : memref<16x32xf32, #tpu.memory_space<vmem>>, vector<16x32xf32>
    tpu.vector_store %arg12[%c0_24, %c0_25], %21 {strides = array<i32>} : memref<16x32xf32, #tpu.memory_space<vmem>>, vector<16x32xf32>,
    return
  }
  func.func @transform_0(%arg0: i32) -> (i32, i32) {
    %c0_i32 = arith.constant 0 : i32
    %c0_i32_0 = arith.constant 0 : i32
    return %arg0, %c0_i32 : i32, i32
  }
  func.func @transform_1(%arg0: i32) -> (i32, i32) {
    %c0_i32 = arith.constant 0 : i32
    %c0_i32_0 = arith.constant 0 : i32
    return %arg0, %c0_i32 : i32, i32
  }
  func.func @transform_2(%arg0: i32) -> (i32, i32) {
    %c0_i32 = arith.constant 0 : i32
    %c0_i32_0 = arith.constant 0 : i32
    return %arg0, %c0_i32 : i32, i32
  }
  func.func @transform_3(%arg0: i32) -> (i32, i32) {
    %c0_i32 = arith.constant 0 : i32
    %c0_i32_0 = arith.constant 0 : i32
    %c0_i32_1 = arith.constant 0 : i32
    return %c0_i32, %c0_i32_0 : i32, i32
  }
  func.func @transform_4(%arg0: i32) -> (i32, i32) {
    %c0_i32 = arith.constant 0 : i32
    %c0_i32_0 = arith.constant 0 : i32
    %c0_i32_1 = arith.constant 0 : i32
    return %c0_i32, %c0_i32_0 : i32, i32
  }
  func.func @transform_5(%arg0: i32) -> (i32, i32) {
    %c0_i32 = arith.constant 0 : i32
    %c0_i32_0 = arith.constant 0 : i32
    %c0_i32_1 = arith.constant 0 : i32
    return %c0_i32, %c0_i32_0 : i32, i32
  }
  func.func @transform_6(%arg0: i32) -> (i32, i32) {
    %c0_i32 = arith.constant 0 : i32
    %c0_i32_0 = arith.constant 0 : i32
    %c0_i32_1 = arith.constant 0 : i32
    return %c0_i32, %c0_i32_0 : i32, i32
  }
  func.func @transform_7(%arg0: i32) -> (i32, i32) {
    %c0_i32 = arith.constant 0 : i32
    %c0_i32_0 = arith.constant 0 : i32
    %c0_i32_1 = arith.constant 0 : i32
    return %c0_i32, %c0_i32_0 : i32, i32
  }
  func.func @transform_8(%arg0: i32) -> (i32, i32) {
    %c0_i32 = arith.constant 0 : i32
    %c0_i32_0 = arith.constant 0 : i32
    %c0_i32_1 = arith.constant 0 : i32
    return %c0_i32, %c0_i32_0 : i32, i32
  }
  func.func @transform_9(%arg0: i32) -> (i32, i32) {
    %c0_i32 = arith.constant 0 : i32
    %c0_i32_0 = arith.constant 0 : i32
    return %arg0, %c0_i32 : i32, i32
  }
  func.func @transform_10(%arg0: i32) -> (i32, i32) {
    %c0_i32 = arith.constant 0 : i32
    %c0_i32_0 = arith.constant 0 : i32
    return %arg0, %c0_i32 : i32, i32
  }
  func.func @transform_11(%arg0: i32) -> (i32, i32) {
    %c0_i32 = arith.constant 0 : i32
    %c0_i32_0 = arith.constant 0 : i32
    return %arg0, %c0_i32 : i32, i32
  }
}

module attributes {stable_mosaic.version = 11 : i64} {
  func.func @_attn_outproj_ln_kernel(%arg0: i32, %arg1: i32, %arg2: i32, %arg3: memref<1x8x32xf32, #tpu.memory_space<vmem>>, %arg4: memref<1x8x32xf32, #tpu.memory_space<vmem>>, %arg5: memref<1x8x32xf32, #tpu.memory_space<vmem>>, %arg6: memref<1x8x32xf32, #tpu.memory_space<vmem>>, %arg7: memref<32x32xf32, #tpu.memory_space<vmem>>, %arg8: memref<1x32xf32, #tpu.memory_space<vmem>>, %arg9: memref<1x32xf32, #tpu.memory_space<vmem>>, %arg10: memref<1x32xf32, #tpu.memory_space<vmem>>, %arg11: memref<1x8x32xf32, #tpu.memory_space<vmem>>, %arg12: memref<4x8x1xf32, #tpu.memory_space<vmem>>, %arg13: memref<4x8x1xf32, #tpu.memory_space<vmem>>, %arg14: memref<4x8x8xf32, #tpu.memory_space<vmem>>) attributes {dimension_semantics = [#tpu.dimension_semantics<parallel>, #tpu.dimension_semantics<parallel>, #tpu.dimension_semantics<arbitrary>], iteration_bounds = array<i64: 2, 1, 1>, scalar_prefetch = 0 : i64, scratch_operands = 3 : i64, tpu.core_type = #tpu.core_type<tc>, window_params = [{transform_indices = @transform_0, window_bounds = array<i64: 1, 8, 32>}, {transform_indices = @transform_1, window_bounds = array<i64: 1, 8, 32>}, {transform_indices = @transform_2, window_bounds = array<i64: 1, 8, 32>}, {transform_indices = @transform_3, window_bounds = array<i64: 1, 8, 32>}, {pipeline_mode = #tpu.pipeline_mode<synchronous>, transform_indices = @transform_4, window_bounds = array<i64: 32, 32>}, {pipeline_mode = #tpu.pipeline_mode<synchronous>, transform_indices = @transform_5, window_bounds = array<i64: 1, 32>}, {pipeline_mode = #tpu.pipeline_mode<synchronous>, transform_indices = @transform_6, window_bounds = array<i64: 1, 32>}, {pipeline_mode = #tpu.pipeline_mode<synchronous>, transform_indices = @transform_7, window_bounds = array<i64: 1, 32>}, {transform_indices = @transform_8, window_bounds = array<i64: 1, 8, 32>}]} {
    %c0_i32 = arith.constant 0 : i32
    %0 = arith.cmpi eq, %arg2, %c0_i32 : i32
    %1 = arith.extui %0 : i1 to i32
    %c0_i32_0 = arith.constant 0 : i32
    %2 = arith.cmpi ne, %1, %c0_i32_0 : i32
    scf.if %2 {
      %cst_95 = arith.constant 0xFF800000 : f32
      %152 = vector.broadcast %cst_95 : f32 to vector<4x8x1xf32>
      %c0_96 = arith.constant 0 : index
      %c0_97 = arith.constant 0 : index
      %c0_98 = arith.constant 0 : index
      %153 = vector.load %arg12[%c0_96, %c0_97, %c0_98] : memref<4x8x1xf32, #tpu.memory_space<vmem>>, vector<4x8x1xf32>
      tpu.vector_store %arg12[%c0_96, %c0_97, %c0_98], %152 {strides = array<i32>} : memref<4x8x1xf32, #tpu.memory_space<vmem>>, vector<4x8x1xf32>,
      %cst_99 = arith.constant 0.000000e+00 : f32
      %154 = vector.broadcast %cst_99 : f32 to vector<4x8x1xf32>
      %c0_100 = arith.constant 0 : index
      %c0_101 = arith.constant 0 : index
      %c0_102 = arith.constant 0 : index
      %155 = vector.load %arg13[%c0_100, %c0_101, %c0_102] : memref<4x8x1xf32, #tpu.memory_space<vmem>>, vector<4x8x1xf32>
      tpu.vector_store %arg13[%c0_100, %c0_101, %c0_102], %154 {strides = array<i32>} : memref<4x8x1xf32, #tpu.memory_space<vmem>>, vector<4x8x1xf32>,
      %cst_103 = arith.constant 0.000000e+00 : f32
      %156 = vector.broadcast %cst_103 : f32 to vector<4x8x8xf32>
      %c0_104 = arith.constant 0 : index
      %c0_105 = arith.constant 0 : index
      %c0_106 = arith.constant 0 : index
      %157 = vector.load %arg14[%c0_104, %c0_105, %c0_106] : memref<4x8x8xf32, #tpu.memory_space<vmem>>, vector<4x8x8xf32>
      tpu.vector_store %arg14[%c0_104, %c0_105, %c0_106], %156 {strides = array<i32>} : memref<4x8x8xf32, #tpu.memory_space<vmem>>, vector<4x8x8xf32>,
    } else {
    }
    %c0 = arith.constant 0 : index
    %c0_1 = arith.constant 0 : index
    %c0_2 = arith.constant 0 : index
    %3 = vector.load %arg3[%c0, %c0_1, %c0_2] : memref<1x8x32xf32, #tpu.memory_space<vmem>>, vector<1x8x32xf32>
    %4 = vector.shape_cast %3 : vector<1x8x32xf32> to vector<8x32xf32>
    %c0_3 = arith.constant 0 : index
    %c0_4 = arith.constant 0 : index
    %c0_5 = arith.constant 0 : index
    %5 = vector.load %arg4[%c0_3, %c0_4, %c0_5] : memref<1x8x32xf32, #tpu.memory_space<vmem>>, vector<1x8x32xf32>
    %6 = vector.shape_cast %5 : vector<1x8x32xf32> to vector<8x32xf32>
    %c0_6 = arith.constant 0 : index
    %c0_7 = arith.constant 0 : index
    %c0_8 = arith.constant 0 : index
    %7 = vector.load %arg5[%c0_6, %c0_7, %c0_8] : memref<1x8x32xf32, #tpu.memory_space<vmem>>, vector<1x8x32xf32>
    %8 = vector.shape_cast %7 : vector<1x8x32xf32> to vector<8x32xf32>
    %9 = vector.extract_strided_slice %4 {offsets = [0, 0], sizes = [8, 8], strides = [1, 1]} : vector<8x32xf32> to vector<8x8xf32>
    %10 = vector.extract_strided_slice %6 {offsets = [0, 0], sizes = [8, 8], strides = [1, 1]} : vector<8x32xf32> to vector<8x8xf32>
    %cst = arith.constant dense<0.000000e+00> : vector<8x8xf32>
    %11 = tpu.matmul %9, %10, %cst {dimension_numbers = #tpu.dot_dimension_numbers<[1], [1], [0], [0], [0, 0, 1, 0], [], []>} : vector<8x8xf32>, vector<8x8xf32>, vector<8x8xf32> -> vector<8x8xf32>
    %c0_9 = arith.constant 0 : index
    %c0_10 = arith.constant 0 : index
    %c0_11 = arith.constant 0 : index
    %12 = vector.load %arg12[%c0_9, %c0_10, %c0_11] : memref<4x8x1xf32, #tpu.memory_space<vmem>>, vector<1x8x1xf32>
    %13 = vector.shape_cast %12 : vector<1x8x1xf32> to vector<8x1xf32>
    %cst_12 = arith.constant dense<0xFF800000> : vector<8xf32>
    %14 = vector.multi_reduction <maximumf>, %11, %cst_12 [1] : vector<8x8xf32> to vector<8xf32>
    %15 = vector.shape_cast %14 : vector<8xf32> to vector<8x1xf32>
    %16 = arith.maximumf %13, %15 : vector<8x1xf32>
    %17 = arith.subf %13, %16 : vector<8x1xf32>
    %18 = math.exp %17 : vector<8x1xf32>
    %19 = vector.broadcast %16 : vector<8x1xf32> to vector<8x8xf32>
    %20 = arith.subf %11, %19 : vector<8x8xf32>
    %21 = math.exp %20 : vector<8x8xf32>
    %c0_13 = arith.constant 0 : index
    %c0_14 = arith.constant 0 : index
    %c0_15 = arith.constant 0 : index
    %22 = vector.load %arg13[%c0_13, %c0_14, %c0_15] : memref<4x8x1xf32, #tpu.memory_space<vmem>>, vector<1x8x1xf32>
    %23 = vector.shape_cast %22 : vector<1x8x1xf32> to vector<8x1xf32>
    %24 = arith.mulf %18, %23 : vector<8x1xf32>
    %cst_16 = arith.constant dense<0.000000e+00> : vector<8xf32>
    %25 = vector.multi_reduction <add>, %21, %cst_16 [1] : vector<8x8xf32> to vector<8xf32>
    %26 = vector.shape_cast %25 : vector<8xf32> to vector<8x1xf32>
    %27 = arith.addf %24, %26 : vector<8x1xf32>
    %c0_17 = arith.constant 0 : index
    %c0_18 = arith.constant 0 : index
    %c0_19 = arith.constant 0 : index
    %28 = vector.load %arg13[%c0_17, %c0_18, %c0_19] : memref<4x8x1xf32, #tpu.memory_space<vmem>>, vector<1x8x1xf32>
    %29 = vector.shape_cast %28 : vector<1x8x1xf32> to vector<8x1xf32>
    %30 = vector.shape_cast %27 : vector<8x1xf32> to vector<1x8x1xf32>
    tpu.vector_store %arg13[%c0_17, %c0_18, %c0_19], %30 {strides = array<i32>} : memref<4x8x1xf32, #tpu.memory_space<vmem>>, vector<1x8x1xf32>,
    %c0_20 = arith.constant 0 : index
    %c0_21 = arith.constant 0 : index
    %c0_22 = arith.constant 0 : index
    %31 = vector.load %arg14[%c0_20, %c0_21, %c0_22] : memref<4x8x8xf32, #tpu.memory_space<vmem>>, vector<1x8x8xf32>
    %32 = vector.shape_cast %31 : vector<1x8x8xf32> to vector<8x8xf32>
    %33 = vector.broadcast %18 : vector<8x1xf32> to vector<8x8xf32>
    %34 = arith.mulf %33, %32 : vector<8x8xf32>
    %35 = vector.extract_strided_slice %8 {offsets = [0, 0], sizes = [8, 8], strides = [1, 1]} : vector<8x32xf32> to vector<8x8xf32>
    %cst_23 = arith.constant dense<0.000000e+00> : vector<8x8xf32>
    %36 = tpu.matmul %21, %35, %cst_23 {dimension_numbers = #tpu.dot_dimension_numbers<[1], [0], [0], [1], [0, 0, 1, 1], [], []>} : vector<8x8xf32>, vector<8x8xf32>, vector<8x8xf32> -> vector<8x8xf32>
    %37 = arith.addf %34, %36 : vector<8x8xf32>
    %c0_24 = arith.constant 0 : index
    %c0_25 = arith.constant 0 : index
    %c0_26 = arith.constant 0 : index
    %38 = vector.load %arg14[%c0_24, %c0_25, %c0_26] : memref<4x8x8xf32, #tpu.memory_space<vmem>>, vector<1x8x8xf32>
    %39 = vector.shape_cast %38 : vector<1x8x8xf32> to vector<8x8xf32>
    %40 = vector.shape_cast %37 : vector<8x8xf32> to vector<1x8x8xf32>
    tpu.vector_store %arg14[%c0_24, %c0_25, %c0_26], %40 {strides = array<i32>} : memref<4x8x8xf32, #tpu.memory_space<vmem>>, vector<1x8x8xf32>,
    %c0_27 = arith.constant 0 : index
    %c0_28 = arith.constant 0 : index
    %c0_29 = arith.constant 0 : index
    %41 = vector.load %arg12[%c0_27, %c0_28, %c0_29] : memref<4x8x1xf32, #tpu.memory_space<vmem>>, vector<1x8x1xf32>
    %42 = vector.shape_cast %41 : vector<1x8x1xf32> to vector<8x1xf32>
    %43 = vector.shape_cast %16 : vector<8x1xf32> to vector<1x8x1xf32>
    tpu.vector_store %arg12[%c0_27, %c0_28, %c0_29], %43 {strides = array<i32>} : memref<4x8x1xf32, #tpu.memory_space<vmem>>, vector<1x8x1xf32>,
    %44 = vector.extract_strided_slice %4 {offsets = [0, 8], sizes = [8, 8], strides = [1, 1]} : vector<8x32xf32> to vector<8x8xf32>
    %45 = vector.extract_strided_slice %6 {offsets = [0, 8], sizes = [8, 8], strides = [1, 1]} : vector<8x32xf32> to vector<8x8xf32>
    %cst_30 = arith.constant dense<0.000000e+00> : vector<8x8xf32>
    %46 = tpu.matmul %44, %45, %cst_30 {dimension_numbers = #tpu.dot_dimension_numbers<[1], [1], [0], [0], [0, 0, 1, 0], [], []>} : vector<8x8xf32>, vector<8x8xf32>, vector<8x8xf32> -> vector<8x8xf32>
    %c1 = arith.constant 1 : index
    %c0_31 = arith.constant 0 : index
    %c0_32 = arith.constant 0 : index
    %47 = vector.load %arg12[%c1, %c0_31, %c0_32] : memref<4x8x1xf32, #tpu.memory_space<vmem>>, vector<1x8x1xf32>
    %48 = vector.shape_cast %47 : vector<1x8x1xf32> to vector<8x1xf32>
    %cst_33 = arith.constant dense<0xFF800000> : vector<8xf32>
    %49 = vector.multi_reduction <maximumf>, %46, %cst_33 [1] : vector<8x8xf32> to vector<8xf32>
    %50 = vector.shape_cast %49 : vector<8xf32> to vector<8x1xf32>
    %51 = arith.maximumf %48, %50 : vector<8x1xf32>
    %52 = arith.subf %48, %51 : vector<8x1xf32>
    %53 = math.exp %52 : vector<8x1xf32>
    %54 = vector.broadcast %51 : vector<8x1xf32> to vector<8x8xf32>
    %55 = arith.subf %46, %54 : vector<8x8xf32>
    %56 = math.exp %55 : vector<8x8xf32>
    %c1_34 = arith.constant 1 : index
    %c0_35 = arith.constant 0 : index
    %c0_36 = arith.constant 0 : index
    %57 = vector.load %arg13[%c1_34, %c0_35, %c0_36] : memref<4x8x1xf32, #tpu.memory_space<vmem>>, vector<1x8x1xf32>
    %58 = vector.shape_cast %57 : vector<1x8x1xf32> to vector<8x1xf32>
    %59 = arith.mulf %53, %58 : vector<8x1xf32>
    %cst_37 = arith.constant dense<0.000000e+00> : vector<8xf32>
    %60 = vector.multi_reduction <add>, %56, %cst_37 [1] : vector<8x8xf32> to vector<8xf32>
    %61 = vector.shape_cast %60 : vector<8xf32> to vector<8x1xf32>
    %62 = arith.addf %59, %61 : vector<8x1xf32>
    %c1_38 = arith.constant 1 : index
    %c0_39 = arith.constant 0 : index
    %c0_40 = arith.constant 0 : index
    %63 = vector.load %arg13[%c1_38, %c0_39, %c0_40] : memref<4x8x1xf32, #tpu.memory_space<vmem>>, vector<1x8x1xf32>
    %64 = vector.shape_cast %63 : vector<1x8x1xf32> to vector<8x1xf32>
    %65 = vector.shape_cast %62 : vector<8x1xf32> to vector<1x8x1xf32>
    tpu.vector_store %arg13[%c1_38, %c0_39, %c0_40], %65 {strides = array<i32>} : memref<4x8x1xf32, #tpu.memory_space<vmem>>, vector<1x8x1xf32>,
    %c1_41 = arith.constant 1 : index
    %c0_42 = arith.constant 0 : index
    %c0_43 = arith.constant 0 : index
    %66 = vector.load %arg14[%c1_41, %c0_42, %c0_43] : memref<4x8x8xf32, #tpu.memory_space<vmem>>, vector<1x8x8xf32>
    %67 = vector.shape_cast %66 : vector<1x8x8xf32> to vector<8x8xf32>
    %68 = vector.broadcast %53 : vector<8x1xf32> to vector<8x8xf32>
    %69 = arith.mulf %68, %67 : vector<8x8xf32>
    %70 = vector.extract_strided_slice %8 {offsets = [0, 8], sizes = [8, 8], strides = [1, 1]} : vector<8x32xf32> to vector<8x8xf32>
    %cst_44 = arith.constant dense<0.000000e+00> : vector<8x8xf32>
    %71 = tpu.matmul %56, %70, %cst_44 {dimension_numbers = #tpu.dot_dimension_numbers<[1], [0], [0], [1], [0, 0, 1, 1], [], []>} : vector<8x8xf32>, vector<8x8xf32>, vector<8x8xf32> -> vector<8x8xf32>
    %72 = arith.addf %69, %71 : vector<8x8xf32>
    %c1_45 = arith.constant 1 : index
    %c0_46 = arith.constant 0 : index
    %c0_47 = arith.constant 0 : index
    %73 = vector.load %arg14[%c1_45, %c0_46, %c0_47] : memref<4x8x8xf32, #tpu.memory_space<vmem>>, vector<1x8x8xf32>
    %74 = vector.shape_cast %73 : vector<1x8x8xf32> to vector<8x8xf32>
    %75 = vector.shape_cast %72 : vector<8x8xf32> to vector<1x8x8xf32>
    tpu.vector_store %arg14[%c1_45, %c0_46, %c0_47], %75 {strides = array<i32>} : memref<4x8x8xf32, #tpu.memory_space<vmem>>, vector<1x8x8xf32>,
    %c1_48 = arith.constant 1 : index
    %c0_49 = arith.constant 0 : index
    %c0_50 = arith.constant 0 : index
    %76 = vector.load %arg12[%c1_48, %c0_49, %c0_50] : memref<4x8x1xf32, #tpu.memory_space<vmem>>, vector<1x8x1xf32>
    %77 = vector.shape_cast %76 : vector<1x8x1xf32> to vector<8x1xf32>
    %78 = vector.shape_cast %51 : vector<8x1xf32> to vector<1x8x1xf32>
    tpu.vector_store %arg12[%c1_48, %c0_49, %c0_50], %78 {strides = array<i32>} : memref<4x8x1xf32, #tpu.memory_space<vmem>>, vector<1x8x1xf32>,
    %79 = vector.extract_strided_slice %4 {offsets = [0, 16], sizes = [8, 8], strides = [1, 1]} : vector<8x32xf32> to vector<8x8xf32>
    %80 = vector.extract_strided_slice %6 {offsets = [0, 16], sizes = [8, 8], strides = [1, 1]} : vector<8x32xf32> to vector<8x8xf32>
    %cst_51 = arith.constant dense<0.000000e+00> : vector<8x8xf32>
    %81 = tpu.matmul %79, %80, %cst_51 {dimension_numbers = #tpu.dot_dimension_numbers<[1], [1], [0], [0], [0, 0, 1, 0], [], []>} : vector<8x8xf32>, vector<8x8xf32>, vector<8x8xf32> -> vector<8x8xf32>
    %c2 = arith.constant 2 : index
    %c0_52 = arith.constant 0 : index
    %c0_53 = arith.constant 0 : index
    %82 = vector.load %arg12[%c2, %c0_52, %c0_53] : memref<4x8x1xf32, #tpu.memory_space<vmem>>, vector<1x8x1xf32>
    %83 = vector.shape_cast %82 : vector<1x8x1xf32> to vector<8x1xf32>
    %cst_54 = arith.constant dense<0xFF800000> : vector<8xf32>
    %84 = vector.multi_reduction <maximumf>, %81, %cst_54 [1] : vector<8x8xf32> to vector<8xf32>
    %85 = vector.shape_cast %84 : vector<8xf32> to vector<8x1xf32>
    %86 = arith.maximumf %83, %85 : vector<8x1xf32>
    %87 = arith.subf %83, %86 : vector<8x1xf32>
    %88 = math.exp %87 : vector<8x1xf32>
    %89 = vector.broadcast %86 : vector<8x1xf32> to vector<8x8xf32>
    %90 = arith.subf %81, %89 : vector<8x8xf32>
    %91 = math.exp %90 : vector<8x8xf32>
    %c2_55 = arith.constant 2 : index
    %c0_56 = arith.constant 0 : index
    %c0_57 = arith.constant 0 : index
    %92 = vector.load %arg13[%c2_55, %c0_56, %c0_57] : memref<4x8x1xf32, #tpu.memory_space<vmem>>, vector<1x8x1xf32>
    %93 = vector.shape_cast %92 : vector<1x8x1xf32> to vector<8x1xf32>
    %94 = arith.mulf %88, %93 : vector<8x1xf32>
    %cst_58 = arith.constant dense<0.000000e+00> : vector<8xf32>
    %95 = vector.multi_reduction <add>, %91, %cst_58 [1] : vector<8x8xf32> to vector<8xf32>
    %96 = vector.shape_cast %95 : vector<8xf32> to vector<8x1xf32>
    %97 = arith.addf %94, %96 : vector<8x1xf32>
    %c2_59 = arith.constant 2 : index
    %c0_60 = arith.constant 0 : index
    %c0_61 = arith.constant 0 : index
    %98 = vector.load %arg13[%c2_59, %c0_60, %c0_61] : memref<4x8x1xf32, #tpu.memory_space<vmem>>, vector<1x8x1xf32>
    %99 = vector.shape_cast %98 : vector<1x8x1xf32> to vector<8x1xf32>
    %100 = vector.shape_cast %97 : vector<8x1xf32> to vector<1x8x1xf32>
    tpu.vector_store %arg13[%c2_59, %c0_60, %c0_61], %100 {strides = array<i32>} : memref<4x8x1xf32, #tpu.memory_space<vmem>>, vector<1x8x1xf32>,
    %c2_62 = arith.constant 2 : index
    %c0_63 = arith.constant 0 : index
    %c0_64 = arith.constant 0 : index
    %101 = vector.load %arg14[%c2_62, %c0_63, %c0_64] : memref<4x8x8xf32, #tpu.memory_space<vmem>>, vector<1x8x8xf32>
    %102 = vector.shape_cast %101 : vector<1x8x8xf32> to vector<8x8xf32>
    %103 = vector.broadcast %88 : vector<8x1xf32> to vector<8x8xf32>
    %104 = arith.mulf %103, %102 : vector<8x8xf32>
    %105 = vector.extract_strided_slice %8 {offsets = [0, 16], sizes = [8, 8], strides = [1, 1]} : vector<8x32xf32> to vector<8x8xf32>
    %cst_65 = arith.constant dense<0.000000e+00> : vector<8x8xf32>
    %106 = tpu.matmul %91, %105, %cst_65 {dimension_numbers = #tpu.dot_dimension_numbers<[1], [0], [0], [1], [0, 0, 1, 1], [], []>} : vector<8x8xf32>, vector<8x8xf32>, vector<8x8xf32> -> vector<8x8xf32>
    %107 = arith.addf %104, %106 : vector<8x8xf32>
    %c2_66 = arith.constant 2 : index
    %c0_67 = arith.constant 0 : index
    %c0_68 = arith.constant 0 : index
    %108 = vector.load %arg14[%c2_66, %c0_67, %c0_68] : memref<4x8x8xf32, #tpu.memory_space<vmem>>, vector<1x8x8xf32>
    %109 = vector.shape_cast %108 : vector<1x8x8xf32> to vector<8x8xf32>
    %110 = vector.shape_cast %107 : vector<8x8xf32> to vector<1x8x8xf32>
    tpu.vector_store %arg14[%c2_66, %c0_67, %c0_68], %110 {strides = array<i32>} : memref<4x8x8xf32, #tpu.memory_space<vmem>>, vector<1x8x8xf32>,
    %c2_69 = arith.constant 2 : index
    %c0_70 = arith.constant 0 : index
    %c0_71 = arith.constant 0 : index
    %111 = vector.load %arg12[%c2_69, %c0_70, %c0_71] : memref<4x8x1xf32, #tpu.memory_space<vmem>>, vector<1x8x1xf32>
    %112 = vector.shape_cast %111 : vector<1x8x1xf32> to vector<8x1xf32>
    %113 = vector.shape_cast %86 : vector<8x1xf32> to vector<1x8x1xf32>
    tpu.vector_store %arg12[%c2_69, %c0_70, %c0_71], %113 {strides = array<i32>} : memref<4x8x1xf32, #tpu.memory_space<vmem>>, vector<1x8x1xf32>,
    %114 = vector.extract_strided_slice %4 {offsets = [0, 24], sizes = [8, 8], strides = [1, 1]} : vector<8x32xf32> to vector<8x8xf32>
    %115 = vector.extract_strided_slice %6 {offsets = [0, 24], sizes = [8, 8], strides = [1, 1]} : vector<8x32xf32> to vector<8x8xf32>
    %cst_72 = arith.constant dense<0.000000e+00> : vector<8x8xf32>
    %116 = tpu.matmul %114, %115, %cst_72 {dimension_numbers = #tpu.dot_dimension_numbers<[1], [1], [0], [0], [0, 0, 1, 0], [], []>} : vector<8x8xf32>, vector<8x8xf32>, vector<8x8xf32> -> vector<8x8xf32>
    %c3 = arith.constant 3 : index
    %c0_73 = arith.constant 0 : index
    %c0_74 = arith.constant 0 : index
    %117 = vector.load %arg12[%c3, %c0_73, %c0_74] : memref<4x8x1xf32, #tpu.memory_space<vmem>>, vector<1x8x1xf32>
    %118 = vector.shape_cast %117 : vector<1x8x1xf32> to vector<8x1xf32>
    %cst_75 = arith.constant dense<0xFF800000> : vector<8xf32>
    %119 = vector.multi_reduction <maximumf>, %116, %cst_75 [1] : vector<8x8xf32> to vector<8xf32>
    %120 = vector.shape_cast %119 : vector<8xf32> to vector<8x1xf32>
    %121 = arith.maximumf %118, %120 : vector<8x1xf32>
    %122 = arith.subf %118, %121 : vector<8x1xf32>
    %123 = math.exp %122 : vector<8x1xf32>
    %124 = vector.broadcast %121 : vector<8x1xf32> to vector<8x8xf32>
    %125 = arith.subf %116, %124 : vector<8x8xf32>
    %126 = math.exp %125 : vector<8x8xf32>
    %c3_76 = arith.constant 3 : index
    %c0_77 = arith.constant 0 : index
    %c0_78 = arith.constant 0 : index
    %127 = vector.load %arg13[%c3_76, %c0_77, %c0_78] : memref<4x8x1xf32, #tpu.memory_space<vmem>>, vector<1x8x1xf32>
    %128 = vector.shape_cast %127 : vector<1x8x1xf32> to vector<8x1xf32>
    %129 = arith.mulf %123, %128 : vector<8x1xf32>
    %cst_79 = arith.constant dense<0.000000e+00> : vector<8xf32>
    %130 = vector.multi_reduction <add>, %126, %cst_79 [1] : vector<8x8xf32> to vector<8xf32>
    %131 = vector.shape_cast %130 : vector<8xf32> to vector<8x1xf32>
    %132 = arith.addf %129, %131 : vector<8x1xf32>
    %c3_80 = arith.constant 3 : index
    %c0_81 = arith.constant 0 : index
    %c0_82 = arith.constant 0 : index
    %133 = vector.load %arg13[%c3_80, %c0_81, %c0_82] : memref<4x8x1xf32, #tpu.memory_space<vmem>>, vector<1x8x1xf32>
    %134 = vector.shape_cast %133 : vector<1x8x1xf32> to vector<8x1xf32>
    %135 = vector.shape_cast %132 : vector<8x1xf32> to vector<1x8x1xf32>
    tpu.vector_store %arg13[%c3_80, %c0_81, %c0_82], %135 {strides = array<i32>} : memref<4x8x1xf32, #tpu.memory_space<vmem>>, vector<1x8x1xf32>,
    %c3_83 = arith.constant 3 : index
    %c0_84 = arith.constant 0 : index
    %c0_85 = arith.constant 0 : index
    %136 = vector.load %arg14[%c3_83, %c0_84, %c0_85] : memref<4x8x8xf32, #tpu.memory_space<vmem>>, vector<1x8x8xf32>
    %137 = vector.shape_cast %136 : vector<1x8x8xf32> to vector<8x8xf32>
    %138 = vector.broadcast %123 : vector<8x1xf32> to vector<8x8xf32>
    %139 = arith.mulf %138, %137 : vector<8x8xf32>
    %140 = vector.extract_strided_slice %8 {offsets = [0, 24], sizes = [8, 8], strides = [1, 1]} : vector<8x32xf32> to vector<8x8xf32>
    %cst_86 = arith.constant dense<0.000000e+00> : vector<8x8xf32>
    %141 = tpu.matmul %126, %140, %cst_86 {dimension_numbers = #tpu.dot_dimension_numbers<[1], [0], [0], [1], [0, 0, 1, 1], [], []>} : vector<8x8xf32>, vector<8x8xf32>, vector<8x8xf32> -> vector<8x8xf32>
    %142 = arith.addf %139, %141 : vector<8x8xf32>
    %c3_87 = arith.constant 3 : index
    %c0_88 = arith.constant 0 : index
    %c0_89 = arith.constant 0 : index
    %143 = vector.load %arg14[%c3_87, %c0_88, %c0_89] : memref<4x8x8xf32, #tpu.memory_space<vmem>>, vector<1x8x8xf32>
    %144 = vector.shape_cast %143 : vector<1x8x8xf32> to vector<8x8xf32>
    %145 = vector.shape_cast %142 : vector<8x8xf32> to vector<1x8x8xf32>
    tpu.vector_store %arg14[%c3_87, %c0_88, %c0_89], %145 {strides = array<i32>} : memref<4x8x8xf32, #tpu.memory_space<vmem>>, vector<1x8x8xf32>,
    %c3_90 = arith.constant 3 : index
    %c0_91 = arith.constant 0 : index
    %c0_92 = arith.constant 0 : index
    %146 = vector.load %arg12[%c3_90, %c0_91, %c0_92] : memref<4x8x1xf32, #tpu.memory_space<vmem>>, vector<1x8x1xf32>
    %147 = vector.shape_cast %146 : vector<1x8x1xf32> to vector<8x1xf32>
    %148 = vector.shape_cast %121 : vector<8x1xf32> to vector<1x8x1xf32>
    tpu.vector_store %arg12[%c3_90, %c0_91, %c0_92], %148 {strides = array<i32>} : memref<4x8x1xf32, #tpu.memory_space<vmem>>, vector<1x8x1xf32>,
    %c0_i32_93 = arith.constant 0 : i32
    %149 = arith.cmpi eq, %arg2, %c0_i32_93 : i32
    %150 = arith.extui %149 : i1 to i32
    %c0_i32_94 = arith.constant 0 : i32
    %151 = arith.cmpi ne, %150, %c0_i32_94 : i32
    scf.if %151 {
      %cst_95 = arith.constant 0.000000e+00 : f32
      %152 = vector.broadcast %cst_95 : f32 to vector<8x32xf32>
      %c0_96 = arith.constant 0 : index
      %c0_97 = arith.constant 0 : index
      %c0_98 = arith.constant 0 : index
      %153 = vector.load %arg14[%c0_96, %c0_97, %c0_98] : memref<4x8x8xf32, #tpu.memory_space<vmem>>, vector<1x8x8xf32>
      %154 = vector.shape_cast %153 : vector<1x8x8xf32> to vector<8x8xf32>
      %c0_99 = arith.constant 0 : index
      %c0_100 = arith.constant 0 : index
      %c0_101 = arith.constant 0 : index
      %155 = vector.load %arg13[%c0_99, %c0_100, %c0_101] : memref<4x8x1xf32, #tpu.memory_space<vmem>>, vector<1x8x1xf32>
      %156 = vector.shape_cast %155 : vector<1x8x1xf32> to vector<8x1xf32>
      %157 = tpu.reciprocal %156 {approx = true} : vector<8x1xf32> -> vector<8x1xf32>
      %158 = vector.broadcast %157 : vector<8x1xf32> to vector<8x8xf32>
      %159 = arith.mulf %154, %158 : vector<8x8xf32>
      %c0_102 = arith.constant 0 : index
      %c0_103 = arith.constant 0 : index
      %160 = vector.load %arg7[%c0_102, %c0_103] : memref<32x32xf32, #tpu.memory_space<vmem>>, vector<8x32xf32>
      %cst_104 = arith.constant dense<0.000000e+00> : vector<8x32xf32>
      %161 = tpu.matmul %159, %160, %cst_104 {dimension_numbers = #tpu.dot_dimension_numbers<[1], [0], [0], [1], [0, 0, 1, 1], [], []>} : vector<8x8xf32>, vector<8x32xf32>, vector<8x32xf32> -> vector<8x32xf32>
      %162 = arith.addf %152, %161 : vector<8x32xf32>
      %c1_105 = arith.constant 1 : index
      %c0_106 = arith.constant 0 : index
      %c0_107 = arith.constant 0 : index
      %163 = vector.load %arg14[%c1_105, %c0_106, %c0_107] : memref<4x8x8xf32, #tpu.memory_space<vmem>>, vector<1x8x8xf32>
      %164 = vector.shape_cast %163 : vector<1x8x8xf32> to vector<8x8xf32>
      %c1_108 = arith.constant 1 : index
      %c0_109 = arith.constant 0 : index
      %c0_110 = arith.constant 0 : index
      %165 = vector.load %arg13[%c1_108, %c0_109, %c0_110] : memref<4x8x1xf32, #tpu.memory_space<vmem>>, vector<1x8x1xf32>
      %166 = vector.shape_cast %165 : vector<1x8x1xf32> to vector<8x1xf32>
      %167 = tpu.reciprocal %166 {approx = true} : vector<8x1xf32> -> vector<8x1xf32>
      %168 = vector.broadcast %167 : vector<8x1xf32> to vector<8x8xf32>
      %169 = arith.mulf %164, %168 : vector<8x8xf32>
      %c8 = arith.constant 8 : index
      %c0_111 = arith.constant 0 : index
      %170 = vector.load %arg7[%c8, %c0_111] : memref<32x32xf32, #tpu.memory_space<vmem>>, vector<8x32xf32>
      %cst_112 = arith.constant dense<0.000000e+00> : vector<8x32xf32>
      %171 = tpu.matmul %169, %170, %cst_112 {dimension_numbers = #tpu.dot_dimension_numbers<[1], [0], [0], [1], [0, 0, 1, 1], [], []>} : vector<8x8xf32>, vector<8x32xf32>, vector<8x32xf32> -> vector<8x32xf32>
      %172 = arith.addf %162, %171 : vector<8x32xf32>
      %c2_113 = arith.constant 2 : index
      %c0_114 = arith.constant 0 : index
      %c0_115 = arith.constant 0 : index
      %173 = vector.load %arg14[%c2_113, %c0_114, %c0_115] : memref<4x8x8xf32, #tpu.memory_space<vmem>>, vector<1x8x8xf32>
      %174 = vector.shape_cast %173 : vector<1x8x8xf32> to vector<8x8xf32>
      %c2_116 = arith.constant 2 : index
      %c0_117 = arith.constant 0 : index
      %c0_118 = arith.constant 0 : index
      %175 = vector.load %arg13[%c2_116, %c0_117, %c0_118] : memref<4x8x1xf32, #tpu.memory_space<vmem>>, vector<1x8x1xf32>
      %176 = vector.shape_cast %175 : vector<1x8x1xf32> to vector<8x1xf32>
      %177 = tpu.reciprocal %176 {approx = true} : vector<8x1xf32> -> vector<8x1xf32>
      %178 = vector.broadcast %177 : vector<8x1xf32> to vector<8x8xf32>
      %179 = arith.mulf %174, %178 : vector<8x8xf32>
      %c16 = arith.constant 16 : index
      %c0_119 = arith.constant 0 : index
      %180 = vector.load %arg7[%c16, %c0_119] : memref<32x32xf32, #tpu.memory_space<vmem>>, vector<8x32xf32>
      %cst_120 = arith.constant dense<0.000000e+00> : vector<8x32xf32>
      %181 = tpu.matmul %179, %180, %cst_120 {dimension_numbers = #tpu.dot_dimension_numbers<[1], [0], [0], [1], [0, 0, 1, 1], [], []>} : vector<8x8xf32>, vector<8x32xf32>, vector<8x32xf32> -> vector<8x32xf32>
      %182 = arith.addf %172, %181 : vector<8x32xf32>
      %c3_121 = arith.constant 3 : index
      %c0_122 = arith.constant 0 : index
      %c0_123 = arith.constant 0 : index
      %183 = vector.load %arg14[%c3_121, %c0_122, %c0_123] : memref<4x8x8xf32, #tpu.memory_space<vmem>>, vector<1x8x8xf32>
      %184 = vector.shape_cast %183 : vector<1x8x8xf32> to vector<8x8xf32>
      %c3_124 = arith.constant 3 : index
      %c0_125 = arith.constant 0 : index
      %c0_126 = arith.constant 0 : index
      %185 = vector.load %arg13[%c3_124, %c0_125, %c0_126] : memref<4x8x1xf32, #tpu.memory_space<vmem>>, vector<1x8x1xf32>
      %186 = vector.shape_cast %185 : vector<1x8x1xf32> to vector<8x1xf32>
      %187 = tpu.reciprocal %186 {approx = true} : vector<8x1xf32> -> vector<8x1xf32>
      %188 = vector.broadcast %187 : vector<8x1xf32> to vector<8x8xf32>
      %189 = arith.mulf %184, %188 : vector<8x8xf32>
      %c24 = arith.constant 24 : index
      %c0_127 = arith.constant 0 : index
      %190 = vector.load %arg7[%c24, %c0_127] : memref<32x32xf32, #tpu.memory_space<vmem>>, vector<8x32xf32>
      %cst_128 = arith.constant dense<0.000000e+00> : vector<8x32xf32>
      %191 = tpu.matmul %189, %190, %cst_128 {dimension_numbers = #tpu.dot_dimension_numbers<[1], [0], [0], [1], [0, 0, 1, 1], [], []>} : vector<8x8xf32>, vector<8x32xf32>, vector<8x32xf32> -> vector<8x32xf32>
      %192 = arith.addf %182, %191 : vector<8x32xf32>
      %c0_129 = arith.constant 0 : index
      %c0_130 = arith.constant 0 : index
      %193 = vector.load %arg8[%c0_129, %c0_130] : memref<1x32xf32, #tpu.memory_space<vmem>>, vector<1x32xf32>
      %194 = vector.broadcast %193 : vector<1x32xf32> to vector<8x32xf32>
      %195 = arith.addf %192, %194 : vector<8x32xf32>
      %c0_131 = arith.constant 0 : index
      %c0_132 = arith.constant 0 : index
      %c0_133 = arith.constant 0 : index
      %196 = vector.load %arg6[%c0_131, %c0_132, %c0_133] : memref<1x8x32xf32, #tpu.memory_space<vmem>>, vector<1x8x32xf32>
      %197 = vector.shape_cast %196 : vector<1x8x32xf32> to vector<8x32xf32>
      %198 = arith.addf %195, %197 : vector<8x32xf32>
      %cst_134 = arith.constant dense<0.000000e+00> : vector<8xf32>
      %199 = vector.multi_reduction <add>, %198, %cst_134 [1] : vector<8x32xf32> to vector<8xf32>
      %200 = vector.shape_cast %199 : vector<8xf32> to vector<8x1xf32>
      %cst_135 = arith.constant 3.200000e+01 : f32
      %201 = vector.broadcast %cst_135 : f32 to vector<8x1xf32>
      %202 = arith.divf %200, %201 : vector<8x1xf32>
      %203 = vector.broadcast %202 : vector<8x1xf32> to vector<8x32xf32>
      %204 = arith.subf %198, %203 : vector<8x32xf32>
      %205 = arith.mulf %204, %204 : vector<8x32xf32>
      %cst_136 = arith.constant dense<0.000000e+00> : vector<8xf32>
      %206 = vector.multi_reduction <add>, %205, %cst_136 [1] : vector<8x32xf32> to vector<8xf32>
      %207 = vector.shape_cast %206 : vector<8xf32> to vector<8x1xf32>
      %cst_137 = arith.constant 3.200000e+01 : f32
      %208 = vector.broadcast %cst_137 : f32 to vector<8x1xf32>
      %209 = arith.divf %207, %208 : vector<8x1xf32>
      %cst_138 = arith.constant 9.99999974E-6 : f32
      %210 = vector.broadcast %cst_138 : f32 to vector<8x1xf32>
      %211 = arith.addf %209, %210 : vector<8x1xf32>
      %212 = math.rsqrt %211 : vector<8x1xf32>
      %213 = vector.broadcast %212 : vector<8x1xf32> to vector<8x32xf32>
      %214 = arith.mulf %204, %213 : vector<8x32xf32>
      %c0_139 = arith.constant 0 : index
      %c0_140 = arith.constant 0 : index
      %215 = vector.load %arg9[%c0_139, %c0_140] : memref<1x32xf32, #tpu.memory_space<vmem>>, vector<1x32xf32>
      %216 = vector.broadcast %215 : vector<1x32xf32> to vector<8x32xf32>
      %217 = arith.mulf %214, %216 : vector<8x32xf32>
      %c0_141 = arith.constant 0 : index
      %c0_142 = arith.constant 0 : index
      %218 = vector.load %arg10[%c0_141, %c0_142] : memref<1x32xf32, #tpu.memory_space<vmem>>, vector<1x32xf32>
      %219 = vector.broadcast %218 : vector<1x32xf32> to vector<8x32xf32>
      %220 = arith.addf %217, %219 : vector<8x32xf32>
      %c0_143 = arith.constant 0 : index
      %c0_144 = arith.constant 0 : index
      %c0_145 = arith.constant 0 : index
      %221 = vector.load %arg11[%c0_143, %c0_144, %c0_145] : memref<1x8x32xf32, #tpu.memory_space<vmem>>, vector<1x8x32xf32>
      %222 = vector.shape_cast %221 : vector<1x8x32xf32> to vector<8x32xf32>
      %223 = vector.shape_cast %220 : vector<8x32xf32> to vector<1x8x32xf32>
      tpu.vector_store %arg11[%c0_143, %c0_144, %c0_145], %223 {strides = array<i32>} : memref<1x8x32xf32, #tpu.memory_space<vmem>>, vector<1x8x32xf32>,
    } else {
    }
    return
  }
  func.func @transform_0(%arg0: i32, %arg1: i32, %arg2: i32) -> (i32, i32, i32) {
    %c0_i32 = arith.constant 0 : i32
    %c0_i32_0 = arith.constant 0 : i32
    return %arg0, %arg1, %c0_i32 : i32, i32, i32
  }
  func.func @transform_1(%arg0: i32, %arg1: i32, %arg2: i32) -> (i32, i32, i32) {
    %c0_i32 = arith.constant 0 : i32
    %c0_i32_0 = arith.constant 0 : i32
    return %arg0, %arg2, %c0_i32 : i32, i32, i32
  }
  func.func @transform_2(%arg0: i32, %arg1: i32, %arg2: i32) -> (i32, i32, i32) {
    %c0_i32 = arith.constant 0 : i32
    %c0_i32_0 = arith.constant 0 : i32
    return %arg0, %arg2, %c0_i32 : i32, i32, i32
  }
  func.func @transform_3(%arg0: i32, %arg1: i32, %arg2: i32) -> (i32, i32, i32) {
    %c0_i32 = arith.constant 0 : i32
    %c0_i32_0 = arith.constant 0 : i32
    return %arg0, %arg1, %c0_i32 : i32, i32, i32
  }
  func.func @transform_4(%arg0: i32, %arg1: i32, %arg2: i32) -> (i32, i32) {
    %c0_i32 = arith.constant 0 : i32
    %c0_i32_0 = arith.constant 0 : i32
    %c0_i32_1 = arith.constant 0 : i32
    return %c0_i32, %c0_i32_0 : i32, i32
  }
  func.func @transform_5(%arg0: i32, %arg1: i32, %arg2: i32) -> (i32, i32) {
    %c0_i32 = arith.constant 0 : i32
    %c0_i32_0 = arith.constant 0 : i32
    %c0_i32_1 = arith.constant 0 : i32
    return %c0_i32, %c0_i32_0 : i32, i32
  }
  func.func @transform_6(%arg0: i32, %arg1: i32, %arg2: i32) -> (i32, i32) {
    %c0_i32 = arith.constant 0 : i32
    %c0_i32_0 = arith.constant 0 : i32
    %c0_i32_1 = arith.constant 0 : i32
    return %c0_i32, %c0_i32_0 : i32, i32
  }
  func.func @transform_7(%arg0: i32, %arg1: i32, %arg2: i32) -> (i32, i32) {
    %c0_i32 = arith.constant 0 : i32
    %c0_i32_0 = arith.constant 0 : i32
    %c0_i32_1 = arith.constant 0 : i32
    return %c0_i32, %c0_i32_0 : i32, i32
  }
  func.func @transform_8(%arg0: i32, %arg1: i32, %arg2: i32) -> (i32, i32, i32) {
    %c0_i32 = arith.constant 0 : i32
    %c0_i32_0 = arith.constant 0 : i32
    return %arg0, %arg1, %c0_i32 : i32, i32, i32
  }
}

</mosaic_0001>

<bundles_post_ra>
// kernel: tpu_custom_call.1
= control target key start
LH: loop header
LB: loop body
LE: loop exit
PB: predicated region body
PF: predicated region fallthrough
CT: control target
= control target key end

     0   :  { %7 = vsyncpa [#allocation3], 0  ;;  %s633_s0 = inlined_call_operand.hbm [shape: f32[16,128], index: 0, kind: input, shape index: {}]   ;;  %s634_s1 = inlined_call_operand.hbm [shape: f32[8,128], index: 1, kind: input, shape index: {}]   ;;  %s635_s2 = inlined_call_operand.hbm [shape: f32[16,128], index: 2, kind: output, shape index: {}]  }
   0x1   :  { %9 = vsyncpa [#allocation3 + $0x1], 0 }
   0x2   :  { %10 = vsyncpa [#allocation6], 0 }
   0x3   :  { %11 = vsyncpa [#allocation4], 0 }
   0x4   :  { %13 = vsyncpa [#allocation4 + $0x1], 0  ;;  %s495_s9 = smov 0   ;;  %s497_s10 = smov 0  }
   0x5   :  { %s499_s11 = smov 0   ;;  %s501_s12 = smov 0  }
   0x6 LB: > { %s516_s13 = sadd.s32 4294967295, %s477_s12   ;;  %s276_s14 = sadd.s32 4294967294, %s477_s12   ;;  %s477_s12 = sphi %s501_s12, %s645_s12   ;;  %s473_s11 = sphi %s499_s11, %s644_s11   ;;  %s469_s10 = sphi %s497_s10, %s643_s10   ;;  %s465_s9 = sphi %s495_s9, %s642_s9  }
   0x7   : > { %p39_p0 = scmp.ne.s32.totalorder %s469_s10, %s465_s9  ;;  %p40_p1 = scmp.eq.s32.totalorder %s516_s13, 0 }
   0x8   : > { %p84_p2 = scmp.eq.s32.totalorder %s516_s13, 1  ;;  %p90_p3 = scmp.eq.s32.totalorder %s276_s14, 1 }
   0x9   : > { %p525_p4 = por %p40_p1, %p39_p0  ;;  %p277_p5 = scmp.ge.s32.totalorder %s477_s12, 1 }
   0xa   : > { %p530_p6 = por %p90_p3, %p39_p0  ;;  %p97_p7 = scmp.lt.s32.totalorder %s477_s12, 3 }
   0xb   : > { %s109_s19 = sshll.u32 %s634_s1, 4  ;;  %s479_s21 = smov [#allocation5]   ;;  %s110_s19 = int_to_ptr.hbm [resolvable:$true] %s109_s19 }
   0xc   : > { %p538_p8 = pnand %p277_p5, %p97_p7  ;;  %s111_s22 = sshll.u32 %s479_s21, 4  ;;  %s112_s22 = int_to_ptr.vmem [resolvable:$true] %s111_s22 }
   0xd   : > { %s548_s23 = sadd.s32 1, %s477_s12   ;;  %s26_s24 = sadd.s32 1, %s473_s11 }
   0xe   : > { %p298_p10 = pneg %p538_p8  ;;  %s23_s25 = ssub.s32 %s477_s12, %s548_s23 }
   0xf   : > { %p24_p12 = scmp.eq.s32.totalorder %s23_s25, 0  ;;  %p33_p13 = scmp.ne.s32.totalorder %s473_s11, %s469_s10 }
  0x10   : > { %p299_p11 = pnand %p298_p10, %p40_p1  ;;  %p34_p0 = scmp.eq.s32.totalorder %s477_s12, 0 }
  0x11   : > { %s557_s26 = scalar_select %p24_p12, %s473_s11, %s26_s24  }
  0x12   : > { %301 = dma.hbm_to_vmem [thread:$0]  (!%p299_p11), %s110_s19, 128, %s112_s22, [#allocation6]  }
  0x13   : > { %p561_p3 = por %p84_p2, %p33_p13  ;;  %p311_p5 = scmp.lt.s32.totalorder %s477_s12, 2 }
  0x14   : > { %s122_s28 = sand.u32 1, %s473_s11   ;;  %s281_s29 = sshll.u32 %s477_s12, 3 }
  0x15   : > { %p35_p7 = por %p34_p0, %p33_p13  ;;  %s280_s30 = sshll.u32 %s122_s28, 3 }
  0x16   : > { %s130_s5 = scalar_lea.hbm %s633_s0, %s281_s29  ;;  %s126_s7 = scalar_lea.vmem [#allocation2], %s280_s30 }
  0x17   : > { %s132_s6 = sshll.u32 %s130_s5, 4  ;;  %s134_s8 = sshll.u32 %s126_s7, 4  ;;  %s133_s6 = int_to_ptr.hbm [resolvable:$true] %s132_s6  ;;  %s135_s8 = int_to_ptr.vmem [resolvable:$true] %s134_s8 }
  0x18   : > { %p571_p10 = pnand %p311_p5, %p35_p7  ;;  %s123_s17 = scalar_lea.sflag [#allocation3], %s122_s28 }
  0x19   : > { %s377_s18 = sshra.s32 %s133_s6, 4  ;;  %s384_s24 = scalar_lea.hbm %s633_s0, 16  ;;  %s378_s18 = int_to_ptr.hbm [resolvable:$true] %s377_s18 }
  0x1a   : > { %s379_s19 = scalar_lea.hbm %s378_s18, 8  ;;  %p381_p11 = pneg %p571_p10 }
  0x1b   : > { %p380_p2 = scmp.ne.s32.totalorder %s378_s18, %s379_s19  ;;  %p385_p0 = scmp.lt.s32.totalorder %s378_s18, %s633_s0 }
  0x1c   : > { %p386_p5 = scmp.lt.s32.totalorder %s384_s24, %s379_s19 }
  0x1d   : > { %p382_p12 = pnand %p381_p11, %p380_p2 }
  0x1e   : > { %p387_p7 = por %p386_p5, %p385_p0 }
  0x1f   : > { %p383_p13 = pneg %p382_p12 }
  0x21   : > { %p388_p9 = pnand %p387_p7, %p383_p13 }
  0x23   : > { %391 = shalt.err (!%p388_p9)
}
  0x24   : > { %305 = dma.hbm_to_vmem [thread:$0]  (!%p571_p10), %s133_s6, 128, %s135_s8, %s123_s17  }
  0x25   : > { %143 = sbr.rel (%p538_p8) target bundleno = 60 (0x3c), region = 28  ;;  %s588_s28 = sand.u32 (!%p538_p8), 1, %s469_s10  }
  0x26   : > { %s283_s30 = sshll.u32 (!%p538_p8), %s588_s28, 3  ;;  %s146_s3 = scalar_lea.sflag (!%p538_p8), [#allocation3], %s588_s28 }
  0x27   : > { %s149_s4 = scalar_lea.vmem (!%p538_p8), [#allocation2], %s283_s30 }
  0x2a   : > { %452 = dma.done.wait (%p525_p4), %s146_s3, 128  }
  0x2b   : > { %454 = vsyncadd (%p525_p4), %s146_s3, 4294967168 }
  0x2c   : > { %456 = dma.done.wait (%p40_p1), [#allocation6], 128  }
  0x2d   : > { %458 = vsyncadd (%p40_p1), [#allocation6], 4294967168  ;;  %s287_s20 = sshll.u32 %s516_s13, 3  ;;  %s175_s8 = scalar_lea.vmem [#allocation7], %s283_s30  ;;  %v176_v0 = vld [vmem:[%s149_s4] sm:$0xff]  ;;  %v177_v1 = vld [vmem:[#allocation5] sm:$0xff] }
  0x2e   : > { %s191_s7 = scalar_lea.hbm %s635_s2, %s287_s20  ;;  %s193_s14 = sshll.u32 %s175_s8, 4  ;;  %v178_v2 = vadd.f32 %v177_v1, %v176_v0  ;;  %s194_s14 = int_to_ptr.vmem [resolvable:$true] %s193_s14 }
  0x2f   : > { %s195_s17 = sshll.u32 %s191_s7, 4  ;;  %s181_s15 = scalar_lea.sflag [#allocation4], %s588_s28  ;;  %s196_s17 = int_to_ptr.hbm [resolvable:$true] %s195_s17 }
  0x30   : > { %179 = vst [vmem:[%s175_s8] sm:$0xff] %v178_v2  ;;  %s421_s18 = sshra.s32 %s196_s17, 4  ;;  %s427_s22 = scalar_lea.hbm %s635_s2, 16  ;;  %s422_s18 = int_to_ptr.hbm [resolvable:$true] %s421_s18 }
  0x31   : > { %s423_s19 = scalar_lea.hbm %s422_s18, 8  ;;  %p428_p9 = scmp.lt.s32.totalorder %s422_s18, %s635_s2 }
  0x32   : > { %p424_p1 = scmp.ne.s32.totalorder %s422_s18, %s423_s19  ;;  %p429_p10 = scmp.lt.s32.totalorder %s427_s22, %s423_s19 }
  0x34   : > { %p425_p4 = pnand %p424_p1, %p561_p3  ;;  %p430_p2 = por %p429_p10, %p428_p9 }
  0x36   : > { %p426_p8 = pneg %p425_p4 }
  0x38   : > { %p431_p11 = pnand %p430_p2, %p426_p8 }
  0x3a   : > { %434 = shalt.err (!%p431_p11)
}
  0x3b   : > { %296 = dma.vmem_to_hbm [thread:$0]  (%p561_p3), %s194_s14, 128, %s196_s17, %s181_s15  }
  0x3c PF: > { %s207_s29 = sand.u32 1, %s465_s9   ;;  %p641_p12 = scmp.ge.s32.totalorder %s477_s12, 2 }
  0x3d   : > { %s208_s28 = scalar_lea.sflag [#allocation4], %s207_s29 }
  0x3e   : > { %p307_p13 = pnand %p641_p12, %p530_p6 }
  0x40   : > { %p308_p0 = pneg %p307_p13 }
  0x42   : > { %460 = dma.done.wait (%p308_p0), %s208_s28, 128  }
  0x43   : > { %462 = vsyncadd (%p308_p0), %s208_s28, 4294967168  ;;  %p16_p5 = scmp.ge.s32.totalorder %s548_s23, 4   ;;  %s642_s9 = smov %s469_s10 }
  0x44   : > { %s643_s10 = smov %s473_s11  ;;  %s644_s11 = smov %s557_s26 }
  0x45   : > { %s645_s12 = smov %s548_s23  ;;  %18 = sbr.rel (!%p16_p5) target bundleno = 6 (0x6), region = 77 }
  0x4a   :  { %214 = vsyncpa [#allocation3], 1 }
  0x4b   :  { %216 = vsyncpa [#allocation3 + $0x1], 1 }
  0x4c   :  { %217 = vsyncpa [#allocation6], 1 }
  0x4d   :  { %218 = vsyncpa [#allocation4], 1 }
  0x4e   :  { %220 = vsyncpa [#allocation4 + $0x1], 1 }

// kernel: transformer_encoder_layer.5
= control target key start
LH: loop header
LB: loop body
LE: loop exit
PB: predicated region body
PF: predicated region fallthrough
CT: control target
= control target key end

     0   :  { %12 = vsyncpa [#allocation4], 0  ;;  %s555_s0 = inlined_call_operand.vmem [shape: f32[16,32], index: 0, kind: input, shape index: {}]   ;;  %s556_s1 = inlined_call_operand.hbm [shape: f32[32,32], index: 1, kind: input, shape index: {}]   ;;  %s557_s2 = inlined_call_operand.vmem [shape: f32[1,32], index: 2, kind: input, shape index: {}]   ;;  %s558_s3 = inlined_call_operand.hbm [shape: f32[32,32], index: 3, kind: input, shape index: {}]   ;;  %s559_s4 = inlined_call_operand.vmem [shape: f32[1,32], index: 4, kind: input, shape index: {}]   ;;  %s560_s5 = inlined_call_operand.hbm [shape: f32[1,32], index: 5, kind: input, shape index: {}]   ;;  %s561_s6 = inlined_call_operand.hbm [shape: f32[1,32], index: 6, kind: input, shape index: {}]   ;;  %s562_s7 = inlined_call_operand.hbm [shape: f32[16,32], index: 7, kind: output, shape index: {}]  }
   0x1   :  { %13 = vsyncpa [#allocation7], 0 }
   0x2   :  { %14 = vsyncpa [#allocation10], 0 }
   0x3   :  { %15 = vsyncpa [#allocation5], 0  ;;  %s37_s26 = sshll.u32 %s558_s3, 4  ;;  %s452_s27 = smov [#allocation6]   ;;  %s38_s26 = int_to_ptr.hbm [resolvable:$true] %s37_s26 }
   0x4   :  { %s39_s28 = sshll.u32 %s452_s27, 4  ;;  %s22_s8 = sshll.u32 %s556_s1, 4  ;;  %s40_s28 = int_to_ptr.vmem [resolvable:$true] %s39_s28  ;;  %s23_s8 = int_to_ptr.hbm [resolvable:$true] %s22_s8 }
   0x5   :  { %s453_s9 = smov 128   ;;  %s454_s10 = smov 8  }
   0x6   :  { %45 = dma.hbm_to_vmem [thread:$0]  %s38_s26, 512, %s40_s28, [#allocation7], %s453_s9, %s453_s9, %s454_s10  }
   0x7   :  { %s455_s11 = smov [#allocation3]   ;;  %s53_s3 = sshll.u32 %s560_s5, 4  ;;  %s54_s3 = int_to_ptr.hbm [resolvable:$true] %s53_s3 }
   0x8   :  { %s24_s12 = sshll.u32 %s455_s11, 4  ;;  %s64_s16 = sshll.u32 %s561_s6, 4  ;;  %s25_s12 = int_to_ptr.vmem [resolvable:$true] %s24_s12  ;;  %s65_s16 = int_to_ptr.hbm [resolvable:$true] %s64_s16 }
   0x9   :  { %30 = dma.hbm_to_vmem [thread:$0]  %s23_s8, 512, %s25_s12, [#allocation4], %s453_s9, %s453_s9, %s454_s10  }
   0xa   :  { %s456_s17 = smov [#allocation8]   ;;  %s457_s19 = smov [#allocation9]  }
   0xb   :  { %s55_s18 = sshll.u32 %s456_s17, 4  ;;  %s66_s20 = sshll.u32 %s457_s19, 4  ;;  %s56_s18 = int_to_ptr.vmem [resolvable:$true] %s55_s18  ;;  %s67_s20 = int_to_ptr.vmem [resolvable:$true] %s66_s20 }
   0xc   :  { %58 = dma.hbm_to_vmem [thread:$0]  %s54_s3, 16, %s56_s18, [#allocation7]  }
   0xd   :  { %69 = dma.hbm_to_vmem [thread:$0]  %s65_s16, 16, %s67_s20, [#allocation10]  }
   0xe   :  { %444 = dma.done.wait [#allocation4], 512  }
   0xf   :  { %445 = vsyncadd [#allocation4], 4294966784 }
  0x10   :  { %446 = dma.done.wait [#allocation7], 528  }
  0x11   :  { %447 = vsyncadd [#allocation7], 4294966768 }
  0x12   :  { %448 = dma.done.wait [#allocation10], 16  }
  0x13   :  { %449 = vsyncadd [#allocation10], 4294967280  ;;  %v98_v0 = vld [vmem:[#allocation3 + $0x18] sm:$0xff]  ;;  %v97_v1 = vld [vmem:[#allocation3 + $0x10] sm:$0xff]  ;;  %vm90_vm0 = vcmask 261120   ;;  %v458_v11 = vmov 0.0  }
  0x14   :  { %122 = vmatpush.msra.mxu0 %v98_v0  ;;  %293 = vmatpush.msra.mxu2 %v98_v0  ;;  %v96_v2 = vld [vmem:[#allocation3 + $0x8] sm:$0xff]  ;;  %v95_v3 = vld [vmem:[#allocation3] sm:$0xff]  ;;  %v93_v4 = vld [vmem:[%s555_s0] sm:$0xff]  ;;  %91 = vst.msk [vmem:[#allocation2] sm:$0xff] %vm90_vm0, %v458_v11  ;;  %v459_v49 = vmov 32.0   ;;  %s274_s28 = sshll.u32 %s562_s7, 4  ;;  %s275_s28 = int_to_ptr.hbm [resolvable:$true] %s274_s28 }
  0x15   :  { %v525_v5 = vld [vmem:[%s555_s0 + $0x8] sm:$0xff]  ;;  %v155_v7 = vld [vmem:[#allocation6 + $0x10] sm:$0xff]  ;;  %v154_v8 = vld [vmem:[#allocation6 + $0x8] sm:$0xff]  ;;  %92 = vst.msk [vmem:[#allocation2 + $0x8] sm:$0xff] %vm90_vm0, %v458_v11 }
  0x16   :  { %123 = vmatpush.msra.mxu0 %v97_v1  ;;  %294 = vmatpush.msra.mxu2 %v97_v1  ;;  %v156_v6 = vld [vmem:[#allocation6 + $0x18] sm:$0xff]  ;;  %v153_v9 = vld [vmem:[#allocation6] sm:$0xff]  ;;  %v310_v10 = vld [vmem:[%s557_s2] ss:$0 sm:$0xff] }
  0x17   :  { %175 = vmatpush.msra.mxu1 %v156_v6  ;;  %297 = vmatpush.msra.mxu3 %v156_v6  ;;  %v311_v37 = vld [vmem:[%s559_s4] ss:$0 sm:$0xff]  ;;  %s460_s4 = smov [#allocation11]  }
  0x18   :  { %124 = vmatpush.msra.mxu0 %v96_v2  ;;  %295 = vmatpush.msra.mxu2 %v96_v2  ;;  %s272_s25 = sshll.u32 %s460_s4, 4  ;;  %s273_s25 = int_to_ptr.vmem [resolvable:$true] %s272_s25 }
  0x19   :  { %176 = vmatpush.msra.mxu1 %v155_v7  ;;  %298 = vmatpush.msra.mxu3 %v155_v7 }
  0x1a   :  { %125 = vmatpush.msra.mxu0 %v95_v3  ;;  %296 = vmatpush.msra.mxu2 %v95_v3 }
  0x1b   :  { %289 = vmatmul.msk.f32.vlgmr.msra.gmra.mxu0 %vm90_vm0, %v93_v4  ;;  %290 = vmatmul.msk.f32.vlgmr.msra.gmra.mxu2 %vm90_vm0, %v525_v5  ;;  %v151_v34 = vld [vmem:[#allocation2] sm:$0xff] }
  0x1c   :  { %177 = vmatpush.msra.mxu1 %v154_v8  ;;  %299 = vmatpush.msra.mxu3 %v154_v8  ;;  %v152_v38 = vld [vmem:[#allocation2 + $0x8] sm:$0xff] }
  0x1e   :  { %178 = vmatpush.msra.mxu1 %v153_v9  ;;  %300 = vmatpush.msra.mxu3 %v153_v9 }
  0x98   :  { %v127_v12 = vpop.f32.mrf.mxu0 }
  0x99   :  { %v128_v13 = vadd.f32 %v310_v10, %v127_v12 }
  0x9b   :  { %v135_v14 = vmul.f32 0.044715, %v128_v13  ;;  %v133_v27 = vmul.f32 0.5, %v128_v13 }
  0x9d   :  { %v137_v15 = vmul.f32 %v135_v14, %v128_v13  ;;  %v312_v14 = vld [vmem:[#allocation8] ss:$0 sm:$0xff] }
  0x9e   :  { %v130_v16 = vpop.f32.mrf.mxu2 }
  0x9f   :  { %v131_v17 = vadd.f32 %v310_v10, %v130_v16  ;;  %v139_v18 = vmul.f32 %v137_v15, %v128_v13 }
  0xa1   :  { %v136_v19 = vmul.f32 0.044715, %v131_v17  ;;  %v141_v20 = vadd.f32 %v139_v18, %v128_v13  ;;  %v134_v31 = vmul.f32 0.5, %v131_v17  ;;  %v313_v18 = vld [vmem:[#allocation9] ss:$0 sm:$0xff] }
  0xa3   :  { %v143_v21 = vmul.f32 0.7978846, %v141_v20  ;;  %v138_v22 = vmul.f32 %v136_v19, %v131_v17 }
  0xa5   :  { %314 = vtanh.f32 %v143_v21  ;;  %v140_v23 = vmul.f32 %v138_v22, %v131_v17 }
  0xa7   :  { %v142_v24 = vadd.f32 %v140_v23, %v131_v17 }
  0xa9   :  { %v144_v25 = vmul.f32 0.7978846, %v142_v24 }
  0xab   :  { %v315_v26 = vpop.eup %314  ;;  %316 = vtanh.f32 %v144_v25 }
  0xac   :  { %v147_v28 = vadd.f32 1.0, %v315_v26  ;;  %318 = vrcp.f32 %v459_v49 }
  0xae   :  { %v149_v29 = vmul.f32 %v147_v28, %v133_v27 }
  0xb0   :  { %291 = vmatmul.msk.f32.vlgmr.msra.gmra.mxu1 %vm90_vm0, %v149_v29 }
  0xb1   :  { %v317_v30 = vpop.eup %316 }
  0xb2   :  { %v148_v32 = vadd.f32 1.0, %v317_v30  ;;  %v319_v50 = vpop.eup %318 }
  0xb3   :  { %v210_v51 = vmul.f32 32.0, %v319_v50  ;;  %vm214_vm1 = vweird.f32 %v319_v50 }
  0xb4   :  { %v150_v33 = vmul.f32 %v148_v32, %v134_v31 }
  0xb5   :  { %v211_v52 = vsub.f32 1.0, %v210_v51 }
  0xb6   :  { %292 = vmatmul.msk.f32.vlgmr.msra.gmra.mxu3 %vm90_vm0, %v150_v33 }
  0xb7   :  { %v212_v53 = vmul.f32 %v319_v50, %v211_v52 }
  0xb9   :  { %v213_v54 = vadd.f32 %v319_v50, %v212_v53 }
  0xbb   :  { %v215_v55 = vsel %vm214_vm1, %v319_v50, %v213_v54 }
 0x12d   :  { %v180_v35 = vpop.f32.mrf.mxu1 }
 0x12e   :  { %v186_v36 = vadd.f32 %v180_v35, %v151_v34 }
 0x130   :  { %188 = vst.msk [vmem:[#allocation2] sm:$0xff] %vm90_vm0, %v186_v36 }
 0x137   :  { %v193_v39 = vld [vmem:[#allocation2] sm:$0xff] }
 0x138   :  { %v199_v40 = vadd.f32 %v311_v37, %v193_v39 }
 0x139   :  { %v183_v41 = vpop.f32.mrf.mxu3 }
 0x13a   :  { %v187_v42 = vadd.f32 %v183_v41, %v152_v38  ;;  %v201_v43 = vadd.f32 %v199_v40, %v93_v4 }
 0x13c   :  { %189 = vst.msk [vmem:[#allocation2 + $0x8] sm:$0xff] %vm90_vm0, %v187_v42  ;;  %v203_v44 = vsel %vm90_vm0, %v201_v43, 0.0 }
 0x13d   :  { %204 = vadd.xlane.f32.xlu0 %v203_v44 }
 0x143   :  { %v194_v45 = vld [vmem:[#allocation2 + $0x8] sm:$0xff] }
 0x144   :  { %v200_v46 = vadd.f32 %v311_v37, %v194_v45 }
 0x146   :  { %v202_v47 = vadd.f32 %v200_v46, %v525_v5 }
 0x148   :  { %v206_v48 = vsel %vm90_vm0, %v202_v47, 0.0 }
 0x149   :  { %207 = vadd.xlane.f32.xlu0 %v206_v48 }
 0x1b0   :  { %v205_v56 = vpop.xlane.xlu0 %204 }
 0x1b1   :  { %v216_v57 = vmul.f32 %v215_v55, %v205_v56 }
 0x1b3   :  { %v218_v58 = vsub.f32 %v201_v43, %v216_v57 }
 0x1b5   :  { %v220_v59 = vmul.f32 %v218_v58, %v218_v58 }
 0x1b7   :  { %v222_v60 = vsel %vm90_vm0, %v220_v59, 0.0 }
 0x1b8   :  { %223 = vadd.xlane.f32.xlu1 %v222_v60 }
 0x1bc   :  { %v208_v61 = vpop.xlane.xlu0 %207 }
 0x1bd   :  { %v217_v62 = vmul.f32 %v215_v55, %v208_v61 }
 0x1bf   :  { %v219_v63 = vsub.f32 %v202_v47, %v217_v62 }
 0x1c1   :  { %v221_v0 = vmul.f32 %v219_v63, %v219_v63 }
 0x1c3   :  { %v225_v1 = vsel %vm90_vm0, %v221_v0, 0.0 }
 0x1c4   :  { %226 = vadd.xlane.f32.xlu1 %v225_v1 }
 0x22b   :  { %v224_v2 = vpop.xlane.xlu1 %223 }
 0x22c   :  { %v228_v3 = vmul.f32 %v224_v2, %v215_v55 }
 0x22e   :  { %v230_v4 = vadd.f32 1e-05, %v228_v3 }
 0x230   :  { %320 = vrsqrt.f32 %v230_v4  ;;  %vm238_vm3 = vweird.f32 %v230_v4 }
 0x236   :  { %v321_v5 = vpop.eup %320 }
 0x237   :  { %v233_v6 = vmul.f32 %v321_v5, %v230_v4  ;;  %v227_v7 = vpop.xlane.xlu1 %226  ;;  %vm239_vm2 = vweird.f32 %v321_v5 }
 0x238   :  { %v229_v8 = vmul.f32 %v227_v7, %v215_v55  ;;  %vm240_vm4 = vmor %vm238_vm3, %vm239_vm2 }
 0x239   :  { %v234_v9 = vmul.f32 %v321_v5, %v233_v6 }
 0x23a   :  { %v231_v10 = vadd.f32 1e-05, %v229_v8 }
 0x23b   :  { %v235_v11 = vmul.f32 0.5, %v234_v9 }
 0x23c   :  { %322 = vrsqrt.f32 %v231_v10  ;;  %vm248_vm6 = vweird.f32 %v231_v10 }
 0x23d   :  { %v236_v12 = vsub.f32 1.5, %v235_v11 }
 0x23f   :  { %v237_v13 = vmul.f32 %v321_v5, %v236_v12 }
 0x241   :  { %v241_v15 = vsel %vm240_vm4, %v321_v5, %v237_v13 }
 0x242   :  { %v323_v16 = vpop.eup %322  ;;  %v252_v17 = vmul.f32 %v241_v15, %v218_v58 }
 0x243   :  { %v243_v19 = vmul.f32 %v323_v16, %v231_v10  ;;  %vm249_vm5 = vweird.f32 %v323_v16 }
 0x244   :  { %v258_v20 = vmul.f32 %v312_v14, %v252_v17  ;;  %vm250_vm7 = vmor %vm248_vm6, %vm249_vm5 }
 0x245   :  { %v244_v21 = vmul.f32 %v323_v16, %v243_v19 }
 0x246   :  { %v264_v22 = vadd.f32 %v313_v18, %v258_v20 }
 0x247   :  { %v245_v23 = vmul.f32 0.5, %v244_v21 }
 0x248   :  { %266 = vst.msk [vmem:[#allocation11] sm:$0xff] %vm90_vm0, %v264_v22 }
 0x249   :  { %v246_v24 = vsub.f32 1.5, %v245_v23 }
 0x24b   :  { %v247_v25 = vmul.f32 %v323_v16, %v246_v24 }
 0x24d   :  { %v251_v26 = vsel %vm250_vm7, %v323_v16, %v247_v25 }
 0x24e   :  { %v253_v27 = vmul.f32 %v251_v26, %v219_v63 }
 0x250   :  { %v259_v28 = vmul.f32 %v312_v14, %v253_v27 }
 0x252   :  { %v265_v29 = vadd.f32 %v313_v18, %v259_v28 }
 0x254   :  { %267 = vst.msk [vmem:[#allocation11 + $0x8] sm:$0xff] %vm90_vm0, %v265_v29 }
 0x255   :  { %280 = dma.vmem_to_hbm [thread:$0]  %s273_s25, 256, %s275_s28, [#allocation5], %s453_s9, %s453_s9, %s454_s10  }
 0x256   :  { %450 = dma.done.wait [#allocation5], 256  }
 0x257   :  { %451 = vsyncadd [#allocation5], 4294967040 }
 0x258   :  { %285 = vsyncpa [#allocation4], 1 }
 0x259   :  { %286 = vsyncpa [#allocation7], 1 }
 0x25a   :  { %287 = vsyncpa [#allocation10], 1 }
 0x25b   :  { %288 = vsyncpa [#allocation5], 1 }

// kernel: transformer_encoder_layer.3
= control target key start
LH: loop header
LB: loop body
LE: loop exit
PB: predicated region body
PF: predicated region fallthrough
CT: control target
= control target key end

     0   :  { %17 = vsyncpa [#allocation3], 0  ;;  %s708_s0 = inlined_call_operand.hbm [shape: f32[16,32], index: 0, kind: input, shape index: {}]   ;;  %s709_s1 = inlined_call_operand.hbm [shape: f32[16,32], index: 1, kind: input, shape index: {}]   ;;  %s710_s2 = inlined_call_operand.hbm [shape: f32[16,32], index: 2, kind: input, shape index: {}]   ;;  %s711_s3 = inlined_call_operand.hbm [shape: f32[32,32], index: 3, kind: input, shape index: {}]   ;;  %s712_s4 = inlined_call_operand.hbm [shape: f32[32,32], index: 4, kind: input, shape index: {}]   ;;  %s713_s5 = inlined_call_operand.hbm [shape: f32[32,32], index: 5, kind: input, shape index: {}]   ;;  %s714_s6 = inlined_call_operand.hbm [shape: f32[1,32], index: 6, kind: input, shape index: {}]   ;;  %s715_s7 = inlined_call_operand.hbm [shape: f32[1,32], index: 7, kind: input, shape index: {}]   ;;  %s716_s8 = inlined_call_operand.hbm [shape: f32[1,32], index: 8, kind: input, shape index: {}]   ;;  %s717_s9 = inlined_call_operand.vmem [shape: f32[16,32], index: 9, kind: output, shape index: {0}]   ;;  %s718_s10 = inlined_call_operand.vmem [shape: f32[16,32], index: 10, kind: output, shape index: {1}]   ;;  %s719_s11 = inlined_call_operand.vmem [shape: f32[16,32], index: 11, kind: output, shape index: {2}]  }
   0x1   :  { %18 = vsyncpa [#allocation5], 0 }
   0x2   :  { %19 = vsyncpa [#allocation8], 0 }
   0x3   :  { %20 = vsyncpa [#allocation11], 0 }
   0x4   :  { %21 = vsyncpa [#allocation14], 0  ;;  %s39_s19 = sshll.u32 %s709_s1, 4  ;;  %s562_s20 = smov [#allocation4]   ;;  %s40_s19 = int_to_ptr.hbm [resolvable:$true] %s39_s19 }
   0x5   :  { %s41_s21 = sshll.u32 %s562_s20, 4  ;;  %s65_s24 = sshll.u32 %s711_s3, 4  ;;  %s42_s21 = int_to_ptr.vmem [resolvable:$true] %s41_s21  ;;  %s66_s24 = int_to_ptr.hbm [resolvable:$true] %s65_s24 }
   0x6   :  { %s563_s25 = smov 128   ;;  %s564_s26 = smov 8  }
   0x7   :  { %47 = dma.hbm_to_vmem [thread:$0]  %s40_s19, 256, %s42_s21, [#allocation5], %s563_s25, %s563_s25, %s564_s26  }
   0x8   :  { %s565_s27 = smov [#allocation7]   ;;  %s91_s1 = sshll.u32 %s713_s5, 4  ;;  %s92_s1 = int_to_ptr.hbm [resolvable:$true] %s91_s1 }
   0x9   :  { %s67_s28 = sshll.u32 %s565_s27, 4  ;;  %s116_s13 = sshll.u32 %s715_s7, 4  ;;  %s68_s28 = int_to_ptr.vmem [resolvable:$true] %s67_s28  ;;  %s117_s13 = int_to_ptr.hbm [resolvable:$true] %s116_s13 }
   0xa   :  { %73 = dma.hbm_to_vmem [thread:$0]  %s66_s24, 512, %s68_s28, [#allocation8], %s563_s25, %s563_s25, %s564_s26  }
   0xb   :  { %s566_s14 = smov [#allocation10]   ;;  %s567_s16 = smov [#allocation13]  }
   0xc   :  { %s93_s15 = sshll.u32 %s566_s14, 4  ;;  %s118_s5 = sshll.u32 %s567_s16, 4  ;;  %s94_s15 = int_to_ptr.vmem [resolvable:$true] %s93_s15  ;;  %s119_s5 = int_to_ptr.vmem [resolvable:$true] %s118_s5 }
   0xd   :  { %99 = dma.hbm_to_vmem [thread:$0]  %s92_s1, 512, %s94_s15, [#allocation11], %s563_s25, %s563_s25, %s564_s26  }
   0xe   :  { %s26_s19 = sshll.u32 %s708_s0, 4  ;;  %s52_s7 = sshll.u32 %s710_s2, 4  ;;  %s27_s19 = int_to_ptr.hbm [resolvable:$true] %s26_s19  ;;  %s53_s7 = int_to_ptr.hbm [resolvable:$true] %s52_s7 }
   0xf   :  { %121 = dma.hbm_to_vmem [thread:$0]  %s117_s13, 16, %s119_s5, [#allocation14]  }
  0x10   :  { %s568_s22 = smov [#allocation2]   ;;  %s569_s24 = smov [#allocation6]  }
  0x11   :  { %s28_s23 = sshll.u32 %s568_s22, 4  ;;  %s54_s27 = sshll.u32 %s569_s24, 4  ;;  %s29_s23 = int_to_ptr.vmem [resolvable:$true] %s28_s23  ;;  %s55_s27 = int_to_ptr.vmem [resolvable:$true] %s54_s27 }
  0x12   :  { %34 = dma.hbm_to_vmem [thread:$0]  %s27_s19, 256, %s29_s23, [#allocation3], %s563_s25, %s563_s25, %s564_s26  }
  0x13   :  { %s78_s0 = sshll.u32 %s712_s4, 4  ;;  %s105_s1 = sshll.u32 %s714_s6, 4  ;;  %s79_s0 = int_to_ptr.hbm [resolvable:$true] %s78_s0  ;;  %s106_s1 = int_to_ptr.hbm [resolvable:$true] %s105_s1 }
  0x14   :  { %60 = dma.hbm_to_vmem [thread:$0]  %s53_s7, 256, %s55_s27, [#allocation5], %s563_s25, %s563_s25, %s564_s26  }
  0x15   :  { %s570_s3 = smov [#allocation9]   ;;  %s571_s13 = smov [#allocation12]  }
  0x16   :  { %s80_s12 = sshll.u32 %s570_s3, 4  ;;  %s107_s4 = sshll.u32 %s571_s13, 4  ;;  %s81_s12 = int_to_ptr.vmem [resolvable:$true] %s80_s12  ;;  %s108_s4 = int_to_ptr.vmem [resolvable:$true] %s107_s4 }
  0x17   :  { %86 = dma.hbm_to_vmem [thread:$0]  %s79_s0, 512, %s81_s12, [#allocation8], %s563_s25, %s563_s25, %s564_s26  }
  0x18   :  { %s127_s16 = sshll.u32 %s716_s8, 4  ;;  %s572_s5 = smov [#allocation15]   ;;  %s128_s16 = int_to_ptr.hbm [resolvable:$true] %s127_s16 }
  0x19   :  { %110 = dma.hbm_to_vmem [thread:$0]  %s106_s1, 16, %s108_s4, [#allocation11]  }
  0x1a   :  { %s129_s17 = sshll.u32 %s572_s5, 4  ;;  %s130_s17 = int_to_ptr.vmem [resolvable:$true] %s129_s17 }
  0x1b   :  { %132 = dma.hbm_to_vmem [thread:$0]  %s128_s16, 16, %s130_s17, [#allocation14]  }
  0x1c   :  { %552 = dma.done.wait [#allocation3], 256  }
  0x1d   :  { %553 = vsyncadd [#allocation3], 4294967040 }
  0x1e   :  { %554 = dma.done.wait [#allocation5], 512  }
  0x1f   :  { %555 = vsyncadd [#allocation5], 4294966784 }
  0x20   :  { %556 = dma.done.wait [#allocation8], 1024  }
  0x21   :  { %557 = vsyncadd [#allocation8], 4294966272 }
  0x22   :  { %558 = dma.done.wait [#allocation11], 528  }
  0x23   :  { %559 = vsyncadd [#allocation11], 4294966768 }
  0x24   :  { %560 = dma.done.wait [#allocation14], 32  }
  0x25   :  { %561 = vsyncadd [#allocation14], 4294967264  ;;  %v259_v0 = vld [vmem:[#allocation10 + $0x18] sm:$0xff]  ;;  %v258_v1 = vld [vmem:[#allocation10 + $0x10] sm:$0xff]  ;;  %vm179_vm0 = vcmask 261120  }
  0x26   :  { %282 = vmatpush.msra.mxu2 %v259_v0  ;;  %v174_v2 = vld [vmem:[#allocation7 + $0x18] sm:$0xff]  ;;  %v257_v4 = vld [vmem:[#allocation10 + $0x8] sm:$0xff]  ;;  %v173_v5 = vld [vmem:[#allocation7 + $0x10] sm:$0xff] }
  0x27   :  { %v218_v3 = vld [vmem:[#allocation9 + $0x18] sm:$0xff]  ;;  %318 = vmatpush.msra.mxu3 %v174_v2  ;;  %v217_v6 = vld [vmem:[#allocation9 + $0x10] sm:$0xff]  ;;  %v172_v7 = vld [vmem:[#allocation7 + $0x8] sm:$0xff]  ;;  %198 = vmatpush.msra.mxu0 %v174_v2 }
  0x28   :  { %241 = vmatpush.msra.mxu1 %v218_v3  ;;  %283 = vmatpush.msra.mxu2 %v258_v1  ;;  %v216_v8 = vld [vmem:[#allocation9 + $0x8] sm:$0xff]  ;;  %v256_v9 = vld [vmem:[#allocation10] sm:$0xff]  ;;  %v254_v10 = vld [vmem:[#allocation6] sm:$0xff] }
  0x29   :  { %319 = vmatpush.msra.mxu3 %v173_v5  ;;  %v171_v11 = vld [vmem:[#allocation7] sm:$0xff]  ;;  %199 = vmatpush.msra.mxu0 %v173_v5  ;;  %v170_v13 = vld [vmem:[#allocation2 + $0x8] sm:$0xff]  ;;  %v169_v15 = vld [vmem:[#allocation2] sm:$0xff] }
  0x2a   :  { %242 = vmatpush.msra.mxu1 %v217_v6  ;;  %284 = vmatpush.msra.mxu2 %v257_v4  ;;  %v215_v12 = vld [vmem:[#allocation9] sm:$0xff]  ;;  %v255_v16 = vld [vmem:[#allocation6 + $0x8] sm:$0xff]  ;;  %v214_v17 = vld [vmem:[#allocation4 + $0x8] sm:$0xff] }
  0x2b   :  { %320 = vmatpush.msra.mxu3 %v172_v7  ;;  %v213_v14 = vld [vmem:[#allocation4] sm:$0xff]  ;;  %200 = vmatpush.msra.mxu0 %v172_v7 }
  0x2c   :  { %243 = vmatpush.msra.mxu1 %v216_v8  ;;  %285 = vmatpush.msra.mxu2 %v256_v9  ;;  %v333_v18 = vld [vmem:[#allocation13] ss:$0 sm:$0xff]  ;;  %v335_v19 = vld [vmem:[#allocation12] ss:$0 sm:$0xff]  ;;  %v334_v22 = vld [vmem:[#allocation15] ss:$0 sm:$0xff] }
  0x2d   :  { %316 = vmatmul.msk.f32.vlgmr.msra.gmra.mxu2 %vm179_vm0, %v254_v10  ;;  %321 = vmatpush.msra.mxu3 %v171_v11 }
  0x2e   :  { %244 = vmatpush.msra.mxu1 %v215_v12  ;;  %313 = vmatmul.msk.f32.vlgmr.msra.gmra.mxu3 %vm179_vm0, %v170_v13 }
  0x2f   :  { %314 = vmatmul.msk.f32.vlgmr.msra.gmra.mxu1 %vm179_vm0, %v213_v14  ;;  %201 = vmatpush.msra.mxu0 %v171_v11 }
  0x30   :  { %312 = vmatmul.msk.f32.vlgmr.msra.gmra.mxu0 %vm179_vm0, %v169_v15 }
  0x35   :  { %317 = vmatmul.msk.f32.gmra.mxu2 %vm179_vm0, %v255_v16 }
  0x37   :  { %315 = vmatmul.msk.f32.gmra.mxu1 %vm179_vm0, %v214_v17 }
  0xac   :  { %v246_v20 = vpop.f32.mrf.mxu1 }
  0xad   :  { %v247_v21 = vadd.f32 %v333_v18, %v246_v20  ;;  %v203_v23 = vpop.f32.mrf.mxu0 }
  0xae   :  { %v204_v24 = vadd.f32 %v335_v19, %v203_v23 }
  0xaf   :  { %252 = vst.msk [vmem:[%s718_s10] sm:$0xff] %vm179_vm0, %v247_v21 }
  0xb0   :  { %v287_v25 = vpop.f32.mrf.mxu2  ;;  %v209_v26 = vmul.f32 0.35355338, %v204_v24 }
  0xb1   :  { %v288_v27 = vadd.f32 %v334_v22, %v287_v25  ;;  %v206_v28 = vpop.f32.mrf.mxu3 }
  0xb2   :  { %211 = vst.msk [vmem:[%s717_s9] sm:$0xff] %vm179_vm0, %v209_v26  ;;  %v207_v29 = vadd.f32 %v335_v19, %v206_v28 }
  0xb3   :  { %293 = vst.msk [vmem:[%s719_s11] sm:$0xff] %vm179_vm0, %v288_v27 }
  0xb4   :  { %v210_v30 = vmul.f32 0.35355338, %v207_v29  ;;  %v249_v31 = vpop.f32.mrf.mxu1 }
  0xb5   :  { %v250_v32 = vadd.f32 %v333_v18, %v249_v31 }
  0xb6   :  { %212 = vst.msk [vmem:[%s717_s9 + $0x8] sm:$0xff] %vm179_vm0, %v210_v30 }
  0xb7   :  { %253 = vst.msk [vmem:[%s718_s10 + $0x8] sm:$0xff] %vm179_vm0, %v250_v32 }
  0xb8   :  { %v290_v33 = vpop.f32.mrf.mxu2 }
  0xb9   :  { %v291_v34 = vadd.f32 %v334_v22, %v290_v33 }
  0xbb   :  { %294 = vst.msk [vmem:[%s719_s11 + $0x8] sm:$0xff] %vm179_vm0, %v291_v34 }
  0xbc   :  { %307 = vsyncpa [#allocation3], 1 }
  0xbd   :  { %308 = vsyncpa [#allocation5], 1 }
  0xbe   :  { %309 = vsyncpa [#allocation8], 1 }
  0xbf   :  { %310 = vsyncpa [#allocation11], 1 }
  0xc0   :  { %311 = vsyncpa [#allocation14], 1 }

// kernel: transformer_encoder_layer.4
= control target key start
LH: loop header
LB: loop body
LE: loop exit
PB: predicated region body
PF: predicated region fallthrough
CT: control target
= control target key end

     0   :  { %s1761_s0 = inlined_call_operand.vmem [shape: f32[2,8,32], index: 0, kind: input, shape index: {}]   ;;  %s1762_s1 = inlined_call_operand.vmem [shape: f32[2,8,32], index: 1, kind: input, shape index: {}]   ;;  %s1763_s2 = inlined_call_operand.vmem [shape: f32[2,8,32], index: 2, kind: input, shape index: {}]   ;;  %s1764_s3 = inlined_call_operand.hbm [shape: f32[2,8,32], index: 3, kind: input, shape index: {}]   ;;  %s1765_s4 = inlined_call_operand.vmem [shape: f32[32,32], index: 4, kind: input, shape index: {}]   ;;  %s1766_s5 = inlined_call_operand.vmem [shape: f32[1,32], index: 5, kind: input, shape index: {}]   ;;  %s1767_s6 = inlined_call_operand.hbm [shape: f32[1,32], index: 6, kind: input, shape index: {}]   ;;  %s1768_s7 = inlined_call_operand.hbm [shape: f32[1,32], index: 7, kind: input, shape index: {}]   ;;  %s1769_s8 = inlined_call_operand.vmem [shape: f32[2,8,32], index: 8, kind: output, shape index: {}]  }
   0x1   :  { %1770 = sst [smem:[#allocation12_spill]] %s1767_s6 }
   0x2   :  { %13 = vsyncpa [#allocation6], 0 }
   0x3   :  { %15 = vsyncpa [#allocation6 + $0x1], 0 }
   0x4   :  { %16 = vsyncpa [#allocation8], 0  ;;  %s1529_s27 = smov 0   ;;  %s1531_s28 = smov 0  }
   0x5   :  { %s1533_s29 = smov 0   ;;  %s1535_s30 = smov 0  }
   0x6   :  { %s1537_s9 = smov 0   ;;  %s1539_s10 = smov 0  }
   0x7 LB: > { %s1178_s11 = sadd.s32 4294967295, %s1473_s10   ;;  %p147_p0 = scmp.ne.s32.totalorder %s1457_s28, %s1453_s27  ;;  %s1473_s10 = sphi %s1539_s10, %s22_s10   ;;  %s1469_s9 = sphi %s1537_s9, %s1780_s9   ;;  %s1465_s30 = sphi %s1535_s30, %s1779_s30   ;;  %s1461_s29 = sphi %s1533_s29, %s1778_s29   ;;  %s1457_s28 = sphi %s1531_s28, %s1777_s28   ;;  %s1453_s27 = sphi %s1529_s27, %s1776_s27  }
   0x8   : > { %p1559_p1 = scmp.eq.s32.totalorder %s1178_s11, 0  ;;  %p1180_p2 = scmp.ge.s32.totalorder %s1473_s10, 1 }
   0x9   : > { %p270_p3 = scmp.lt.s32.totalorder %s1473_s10, 3  ;;  %s1773_s6 = sld [smem:[#allocation12_spill]] }
   0xa   : > { %p1567_p4 = por %p1559_p1, %p147_p0  ;;  %s1475_s18 = smov [#allocation7]  }
   0xb   : > { %p1574_p5 = pnand %p1180_p2, %p270_p3  ;;  %s290_s19 = sshll.u32 %s1475_s18, 4  ;;  %s291_s19 = int_to_ptr.vmem [resolvable:$true] %s290_s19 }
   0xc   : > { %s300_s22 = sshll.u32 %s1768_s7, 4  ;;  %s1476_s23 = smov [#allocation9]   ;;  %s301_s22 = int_to_ptr.hbm [resolvable:$true] %s300_s22 }
   0xd   : > { %p1222_p6 = pneg %p1574_p5  ;;  %s302_s24 = sshll.u32 %s1476_s23, 4  ;;  %s303_s24 = int_to_ptr.vmem [resolvable:$true] %s302_s24 }
   0xe   : > { %s41_s25 = sadd.s32 1, %s1469_s9  ;;  %s134_s26 = sadd.s32 1, %s1461_s29 }
   0xf   : > { %s288_s16 = sshll.u32 %s1773_s6, 4  ;;  %p1223_p7 = pnand %p1222_p6, %p1559_p1  ;;  %s289_s16 = int_to_ptr.hbm [resolvable:$true] %s288_s16 }
  0x10   : > { %p43_p8 = scmp.ge.s32.totalorder %s41_s25, 2  ;;  %p141_p9 = scmp.ne.s32.totalorder %s1461_s29, %s1457_s28 }
  0x11   : > { %1225 = dma.hbm_to_vmem [thread:$0]  (!%p1223_p7), %s289_s16, 16, %s291_s19, [#allocation8]  }
  0x12   : > { %1228 = dma.hbm_to_vmem [thread:$0]  (!%p1223_p7), %s301_s22, 16, %s303_s24, [#allocation8]  }
  0x13   : > { %p142_p10 = scmp.eq.s32.totalorder %s1473_s10, 0  ;;  %p1235_p11 = scmp.lt.s32.totalorder %s1473_s10, 2 }
  0x14   : > { %s1782_s25 = smov (%p43_p8, %s41_s25), 0  ;;  %s343_s11 = sand.u32 1, %s1461_s29  }
  0x15   : > { %p1593_p12 = por %p142_p10, %p141_p9  ;;  %s129_s14 = ssub.s32 %s1469_s9, %s1782_s25 }
  0x16   : > { %p132_p13 = scmp.eq.s32.totalorder %s129_s14, 0  ;;  %s1184_s15 = sshll.u32 %s343_s11, 3 }
  0x17   : > { %s1185_s16 = sshll.u32 %s1469_s9, 3  ;;  %s347_s22 = scalar_lea.vmem [#allocation5], %s1184_s15 }
  0x18   : > { %s1602_s18 = scalar_select %p132_p13, %s1461_s29, %s134_s26  }
  0x19   : > { %s352_s21 = scalar_lea.hbm %s1764_s3, %s1185_s16  ;;  %s356_s23 = sshll.u32 %s347_s22, 4  ;;  %s357_s23 = int_to_ptr.vmem [resolvable:$true] %s356_s23 }
  0x1a   : > { %s354_s24 = sshll.u32 %s352_s21, 4  ;;  %p1230_p0 = pnand %p1235_p11, %p1593_p12  ;;  %s355_s24 = int_to_ptr.hbm [resolvable:$true] %s354_s24 }
  0x1b   : > { %s344_s6 = scalar_lea.sflag [#allocation6], %s343_s11  ;;  %365 = sbr.rel (%p1574_p5) target bundleno = 1424 (0x590), region = 52 }
  0x1c   : > { %1232 = dma.hbm_to_vmem [thread:$0]  (!%p1230_p0), %s355_s24, 128, %s357_s23, %s344_s6  }
  0x1d   : > { %s367_s26 = sand.u32 (!%p1574_p5), 1, %s1457_s28  }
  0x1e   : > { %s1614_s14 = sshll.u32 (!%p1574_p5), %s367_s26, 3  ;;  %s368_s16 = scalar_lea.sflag (!%p1574_p5), [#allocation6], %s367_s26 }
  0x1f   : > { %s371_s15 = scalar_lea.vmem (!%p1574_p5), [#allocation5], %s1614_s14 }
  0x20   : > { %1444 = dma.done.wait (%p1567_p4), %s368_s16, 128  }
  0x21   : > { %1446 = vsyncadd (%p1567_p4), %s368_s16, 4294967168 }
  0x22   : > { %1448 = dma.done.wait (%p1559_p1), [#allocation8], 32  }
  0x23   : > { %1450 = vsyncadd (%p1559_p1), [#allocation8], 4294967264  ;;  %p438_p2 = scmp.lt.s32.totalorder %s1465_s30, 1  ;;  %vm479_vm0 = vcmask 64512   ;;  %s1477_s12 = smov 104   ;;  %vm470_vm1 = vcmask 7168  }
  0x24   : > { %s1479_s21 = smov 112   ;;  %v1480_v8 = vmov -inf   ;;  %v1481_v9 = vmov 0   ;;  %v1482_v10 = vmov 0.0   ;;  %vm986_vm2 = vcmask 261120  }
  0x25   : > { %s1784_s30 = smov (!%p438_p2, %s1465_s30), 1  ;;  %471 = vst.msk [vmem:[#allocation2] sm:$0xff] %vm470_vm1, %v1480_v8  ;;  %1295 = vset.pattern.permute.xlu0 %v1481_v9  ;;  %1297 = vset.pattern.permute.xlu1 %v1481_v9 }
  0x26   : > { %s1627_s6 = sshll.u32 %s1784_s30, 3  ;;  %s1478_s30 = smov 120   ;;  %472 = vst.msk [vmem:[#allocation2 + $0x8] sm:$0xff] %vm470_vm1, %v1480_v8  ;;  %1296 = vset.pattern.permute.xlu2 %v1481_v9 }
  0x27   : > { %s451_s11 = scalar_lea.vmem %s1762_s1, %s1627_s6  ;;  %s444_s20 = scalar_lea.vmem %s1761_s0, %s1627_s6  ;;  %473 = vst.msk [vmem:[#allocation2 + $0x10] sm:$0xff] %vm470_vm1, %v1480_v8 }
  0x28   : > { %v485_v0 = vld [vmem:[%s451_s11] sm:$0xff]  ;;  %474 = vst.msk [vmem:[#allocation2 + $0x18] sm:$0xff] %vm470_vm1, %v1480_v8  ;;  %s458_s24 = scalar_lea.vmem %s1763_s2, %s1627_s6 }
  0x29   : > { %754 = vrot.lane.b32.xlu2 %v485_v0, %s1477_s12  ;;  %1194 = vmatpush.xpose.msk.msra.mxu0 %vm479_vm0, %v485_v0  ;;  %v484_v1 = vld [vmem:[%s444_s20] sm:$0xff]  ;;  %475 = vst.msk [vmem:[#allocation3] sm:$0xff] %vm470_vm1, %v1482_v10 }
  0x2a   : > { %573 = vrot.lane.b32.xlu1 %v485_v0, %s1478_s30  ;;  %476 = vst.msk [vmem:[#allocation3 + $0x8] sm:$0xff] %vm470_vm1, %v1482_v10  ;;  %v1669_v19 = vld [vmem:[%s458_s24] sm:$0xff] }
  0x2b   : > { %477 = vst.msk [vmem:[#allocation3 + $0x10] sm:$0xff] %vm470_vm1, %v1482_v10  ;;  %563 = vmatpush.msra.mxu1 %v1669_v19 }
  0x2c   : > { %1195 = vmatmul.msk.f32.vlgmr.msra.gmra.mxu0 %vm479_vm0, %v484_v1  ;;  %478 = vst.msk [vmem:[#allocation3 + $0x18] sm:$0xff] %vm470_vm1, %v1482_v10  ;;  %v514_v13 = vld [vmem:[#allocation2] sm:$0xff] }
  0x2d   : > { %480 = vst.msk [vmem:[#allocation4] sm:$0xff] %vm479_vm0, %v1482_v10  ;;  %v600_v29 = vld [vmem:[#allocation2 + $0x8] sm:$0xff] }
  0x2e   : > { %481 = vst.msk [vmem:[#allocation4 + $0x8] sm:$0xff] %vm479_vm0, %v1482_v10  ;;  %v691_v58 = vld [vmem:[#allocation2 + $0x10] sm:$0xff] }
  0x2f   : > { %482 = vst.msk [vmem:[#allocation4 + $0x10] sm:$0xff] %vm479_vm0, %v1482_v10  ;;  %v1673_v22 = vld [vmem:[#allocation2 + $0x18] sm:$0xff] }
  0x30   : > { %483 = vst.msk [vmem:[#allocation4 + $0x18] sm:$0xff] %vm479_vm0, %v1482_v10  ;;  %v530_v43 = vld [vmem:[#allocation3] sm:$0xff] }
  0x31   : > { %752 = vrot.lane.b32.xlu2 %v484_v1, %s1477_s12 }
  0x32   : > { %571 = vrot.lane.b32.xlu1 %v484_v1, %s1478_s30 }
  0x39   : > { %662 = vrot.lane.b32.xlu2 %v484_v1, %s1479_s21 }
  0x3a   : > { %664 = vrot.lane.b32.xlu1 %v485_v0, %s1479_s21  ;;  %v617_v0 = vld [vmem:[#allocation3 + $0x8] sm:$0xff] }
  0x83   : > { %v755_v2 = vpop.permute.xlu2 %754 }
  0x84   : > { %1203 = vmatpush.xpose.msk.msrb.mxu0 %vm479_vm0, %v755_v2 }
  0x8b   : > { %v753_v3 = vpop.permute.xlu2 %752 }
  0x8c   : > { %1204 = vmatmul.msk.f32.vlgmr.msrb.gmra.mxu0 %vm479_vm0, %v753_v3 }
  0x93   : > { %v663_v20 = vpop.permute.xlu2 %662 }
  0x9c   : > { %v574_v4 = vpop.permute.xlu1 %573 }
  0x9d   : > { %1197 = vmatpush.xpose.msk.msra.mxu2 %vm479_vm0, %v574_v4 }
  0xa4   : > { %v572_v5 = vpop.permute.xlu1 %571 }
  0xa5   : > { %1198 = vmatmul.msk.f32.vlgmr.msra.gmra.mxu2 %vm479_vm0, %v572_v5 }
  0xa9   : > { %v511_v6 = vpop.f32.mrf.mxu0 }
  0xaa   : > { %v515_v7 = vsel %vm479_vm0, %v511_v6, -inf }
  0xab   : > { %516 = vmax.xlane.f32.xlu0 %v515_v7 }
  0xac   : > { %v665_v21 = vpop.permute.xlu1 %664 }
  0xad   : > { %1200 = vmatpush.xpose.msk.msrb.mxu1 %vm479_vm0, %v665_v21  ;;  %v854_v21 = vld [vmem:[%s1765_s4] sm:$0xff] }
 0x109   : > { %v777_v11 = vpop.f32.mrf.mxu0 }
 0x10a   : > { %v782_v12 = vsel %vm479_vm0, %v777_v11, -inf }
 0x10b   : > { %783 = vmax.xlane.f32.xlu2 %v782_v12 }
 0x11e   : > { %v517_v14 = vpop.xlane.xlu0 %516 }
 0x11f   : > { %v518_v15 = vmax.f32 %v514_v13, %v517_v14 }
 0x121   : > { %v519_v16 = vsub.f32 %v514_v13, %v518_v15  ;;  %570 = vst.msk [vmem:[#allocation2] sm:$0xff] %vm470_vm1, %v518_v15  ;;  %524 = vperm.xlu0 %1295, %v518_v15  }
 0x123   : > { %v520_v40 = vmul.f32 1.442695, %v519_v16  ;;  %v625_v16 = vld [vmem:[#allocation4 + $0x8] sm:$0xff] }
 0x128   : > { %v596_v17 = vpop.f32.mrf.mxu2 }
 0x129   : > { %v601_v18 = vsel %vm479_vm0, %v596_v17, -inf }
 0x12a   : > { %602 = vmax.xlane.f32.xlu1 %v601_v18 }
 0x17e   : > { %v784_v23 = vpop.xlane.xlu2 %783 }
 0x17f   : > { %v1676_v24 = vmax.f32 %v1673_v22, %v784_v23  ;;  %v798_v23 = vld [vmem:[#allocation3 + $0x18] sm:$0xff] }
 0x181   : > { %v786_v25 = vsub.f32 %v1673_v22, %v1676_v24  ;;  %841 = vst.msk [vmem:[#allocation2 + $0x18] sm:$0xff] %vm470_vm1, %v1676_v24  ;;  %791 = vperm.xlu1 %1297, %v1676_v24   ;;  %v864_v22 = vld [vmem:[%s1765_s4 + $0x8] sm:$0xff] }
 0x183   : > { %v787_v14 = vmul.f32 1.442695, %v786_v25 }
 0x189   : > { %813 = vrot.lane.b32.xlu1 %v1669_v19, %s1477_s12 }
 0x193   : > { %v525_v26 = vpop.permute.xlu0 %524 }
 0x194   : > { %v527_v27 = vsub.f32 %v511_v6, %v525_v26 }
 0x196   : > { %v528_v28 = vmul.f32 1.442695, %v527_v27  ;;  %v538_v27 = vld [vmem:[#allocation4] sm:$0xff] }
 0x198   : > { %1301 = vpow2.f32 %v528_v28 }
 0x19d   : > { %v603_v30 = vpop.xlane.xlu1 %602 }
 0x19e   : > { %v1302_v31 = vpop.eup %1301  ;;  %v604_v32 = vmax.f32 %v600_v29, %v603_v30 }
 0x19f   : > { %1196 = vmatmul.msk.f32.vlgmr.msra.gmra.mxu1 %vm479_vm0, %v1302_v31  ;;  %v532_v34 = vsel %vm479_vm0, %v1302_v31, 0.0 }
 0x1a0   : > { %v605_v33 = vsub.f32 %v600_v29, %v604_v32  ;;  %661 = vst.msk [vmem:[#allocation2 + $0x8] sm:$0xff] %vm470_vm1, %v604_v32  ;;  %610 = vperm.xlu2 %1296, %v604_v32   ;;  %883 = vmatpush.msra.mxu1 %v864_v22 }
 0x1a2   : > { %v606_v54 = vmul.f32 1.442695, %v605_v33 }
 0x1a7   : > { %1201 = vmatmul.msk.f32.vlgmr.msrb.gmra.mxu1 %vm479_vm0, %v663_v20 }
 0x1b3   : > { %533 = vadd.xlane.f32.xlu1 %v532_v34 }
 0x1f3   : > { %v792_v35 = vpop.permute.xlu1 %791 }
 0x1f4   : > { %v794_v36 = vsub.f32 %v777_v11, %v792_v35 }
 0x1f6   : > { %v795_v37 = vmul.f32 1.442695, %v794_v36 }
 0x1f8   : > { %1303 = vpow2.f32 %v795_v37 }
 0x1f9   : > { %1305 = vpow2.f32 %v520_v40  ;;  %v708_v40 = vld [vmem:[#allocation3 + $0x10] sm:$0xff] }
 0x1fa   : > { %v611_v49 = vpop.permute.xlu2 %610 }
 0x1fb   : > { %v814_v38 = vpop.permute.xlu1 %813  ;;  %v613_v50 = vsub.f32 %v596_v17, %v611_v49 }
 0x1fc   : > { %834 = vmatpush.msrb.mxu2 %v814_v38 }
 0x1fd   : > { %v614_v51 = vmul.f32 1.442695, %v613_v50  ;;  %v806_v50 = vld [vmem:[#allocation4 + $0x18] sm:$0xff] }
 0x1fe   : > { %v1304_v39 = vpop.eup %1303 }
 0x1ff   : > { %1205 = vmatmul.msk.f32.vlgmr.msrb.gmra.mxu2 %vm479_vm0, %v1304_v39  ;;  %v1306_v42 = vpop.eup %1305  ;;  %1307 = vpow2.f32 %v614_v51  ;;  %v800_v63 = vsel %vm479_vm0, %v1304_v39, 0.0 }
 0x200   : > { %v531_v46 = vmul.f32 %v1306_v42, %v530_v43  ;;  %1309 = vpow2.f32 %v606_v54 }
 0x205   : > { %v1308_v52 = vpop.eup %1307 }
 0x206   : > { %v619_v53 = vsel %vm479_vm0, %v1308_v52, 0.0  ;;  %v1310_v55 = vpop.eup %1309 }
 0x207   : > { %v618_v1 = vmul.f32 %v1310_v55, %v617_v0 }
 0x21c   : > { %v1690_v41 = vpop.f32.mrf.mxu1 }
 0x224   : > { %v687_v44 = vpop.f32.mrf.mxu1 }
 0x225   : > { %v692_v45 = vsel %vm479_vm0, %v687_v44, -inf }
 0x226   : > { %693 = vmax.xlane.f32.xlu0 %v692_v45  ;;  %v534_v47 = vpop.xlane.xlu1 %533  ;;  %v716_v45 = vld [vmem:[#allocation4 + $0x10] sm:$0xff] }
 0x227   : > { %v535_v48 = vadd.f32 %v534_v47, %v531_v46 }
 0x229   : > { %537 = vst.msk [vmem:[#allocation3] sm:$0xff] %vm470_vm1, %v535_v48 }
 0x230   : > { %v846_v56 = vld [vmem:[#allocation3] sm:$0xff] }
 0x231   : > { %1311 = vrcp.f32 %v846_v56  ;;  %v920_v56 = vld [vmem:[%s1765_s4 + $0x10] sm:$0xff] }
 0x232   : > { %939 = vmatpush.msra.mxu0 %v920_v56 }
 0x237   : > { %v1312_v57 = vpop.eup %1311 }
 0x23a   : > { %633 = vrot.lane.b32.xlu0 %v1669_v19, %s1478_s30 }
 0x264   : > { %620 = vadd.xlane.f32.xlu0 %v619_v53 }
 0x278   : > { %628 = vperm.xlu0 %1295, %v1310_v55   ;;  %v954_v55 = vld [vmem:[%s1765_s4 + $0x18] sm:$0xff] }
 0x279   : > { %973 = vmatpush.msra.mxu2 %v954_v55 }
 0x280   : > { %850 = vperm.xlu0 %1295, %v1312_v57  }
 0x282   : > { %v836_v53 = vpop.f32.mrf.mxu2 }
 0x299   : > { %v694_v59 = vpop.xlane.xlu0 %693 }
 0x29a   : > { %v695_v60 = vmax.f32 %v691_v58, %v694_v59 }
 0x29c   : > { %v696_v61 = vsub.f32 %v691_v58, %v695_v60  ;;  %751 = vst.msk [vmem:[#allocation2 + $0x10] sm:$0xff] %vm470_vm1, %v695_v60  ;;  %701 = vperm.xlu2 %1296, %v695_v60  }
 0x29e   : > { %v697_v4 = vmul.f32 1.442695, %v696_v61 }
 0x2a0   : > { %1313 = vpow2.f32 %v697_v4  ;;  %v1298_v4 = vld [vmem:[%s1766_s5] ss:$0 sm:$0xff] }
 0x2a4   : > { %723 = vrot.lane.b32.xlu2 %v1669_v19, %s1479_s21  ;;  %s465_s21 = scalar_lea.vmem %s1769_s8, %s1627_s6 }
 0x2a6   : > { %v1314_v6 = vpop.eup %1313 }
 0x2ac   : > { %v634_v62 = vpop.permute.xlu0 %633 }
 0x2ad   : > { %654 = vmatpush.msra.mxu3 %v634_v62 }
 0x2ae   : > { %1199 = vmatmul.msk.f32.vlgmr.msra.gmra.mxu3 %vm479_vm0, %v1308_v52 }
 0x2cd   : > { %801 = vadd.xlane.f32.xlu2 %v800_v63 }
 0x2d7   : > { %v621_v2 = vpop.xlane.xlu0 %620 }
 0x2d8   : > { %v622_v3 = vadd.f32 %v621_v2, %v618_v1 }
 0x2da   : > { %623 = vst.msk [vmem:[#allocation3 + $0x8] sm:$0xff] %vm470_vm1, %v622_v3 }
 0x2e1   : > { %v856_v5 = vld [vmem:[#allocation3 + $0x8] sm:$0xff] }
 0x2e2   : > { %1315 = vrcp.f32 %v856_v5 }
 0x2e5   : > { %541 = vperm.xlu2 %1296, %v1306_v42   ;;  %v709_v42 = vmul.f32 %v1314_v6, %v708_v40 }
 0x2e8   : > { %v1316_v7 = vpop.eup %1315 }
 0x2ea   : > { %v629_v17 = vpop.permute.xlu0 %628 }
 0x2eb   : > { %v631_v18 = vmul.f32 %v629_v17, %v625_v16 }
 0x2ed   : > { %719 = vperm.xlu2 %1296, %v1314_v6  }
 0x2f2   : > { %v851_v34 = vpop.permute.xlu0 %850 }
 0x2f5   : > { %860 = vperm.xlu2 %1296, %v1316_v7   ;;  %v984_v7 = vld [vmem:[%s371_s15] sm:$0xff] }
 0x2f6   : > { %v702_v8 = vpop.permute.xlu2 %701 }
 0x2f7   : > { %v704_v9 = vsub.f32 %v687_v44, %v702_v8 }
 0x2f9   : > { %v705_v10 = vmul.f32 1.442695, %v704_v9 }
 0x2fb   : > { %1317 = vpow2.f32 %v705_v10 }
 0x2fc   : > { %1319 = vpow2.f32 %v787_v14 }
 0x2fe   : > { %v724_v11 = vpop.permute.xlu2 %723 }
 0x2ff   : > { %744 = vmatpush.msrb.mxu3 %v724_v11  ;;  %v1483_v11 = vmov 32.0  }
 0x301   : > { %v1318_v12 = vpop.eup %1317  ;;  %906 = vmatpush.msra.mxu3 %v854_v21 }
 0x302   : > { %1202 = vmatmul.msk.f32.vlgmr.msrb.gmra.mxu3 %vm479_vm0, %v1318_v12  ;;  %v710_v13 = vsel %vm479_vm0, %v1318_v12, 0.0  ;;  %v1320_v15 = vpop.eup %1319 }
 0x303   : > { %711 = vadd.xlane.f32.xlu1 %v710_v13  ;;  %v799_v24 = vmul.f32 %v1320_v15, %v798_v23 }
 0x31c   : > { %809 = vperm.xlu1 %1297, %v1320_v15  }
 0x331   : > { %v656_v19 = vpop.f32.mrf.mxu3 }
 0x332   : > { %v659_v20 = vadd.f32 %v656_v19, %v631_v18 }
 0x334   : > { %660 = vst.msk [vmem:[#allocation4 + $0x8] sm:$0xff] %vm479_vm0, %v659_v20 }
 0x33b   : > { %v855_v37 = vld [vmem:[#allocation4 + $0x8] sm:$0xff] }
 0x340   : > { %v802_v25 = vpop.xlane.xlu2 %801 }
 0x341   : > { %v803_v26 = vadd.f32 %v802_v25, %v799_v24 }
 0x343   : > { %804 = vst.msk [vmem:[#allocation3 + $0x18] sm:$0xff] %vm470_vm1, %v803_v26 }
 0x348   : > { %v542_v28 = vpop.permute.xlu2 %541 }
 0x349   : > { %v544_v29 = vmul.f32 %v542_v28, %v538_v27 }
 0x34a   : > { %v946_v30 = vld [vmem:[#allocation3 + $0x18] sm:$0xff] }
 0x34b   : > { %v568_v31 = vadd.f32 %v1690_v41, %v544_v29  ;;  %1321 = vrcp.f32 %v946_v30 }
 0x34d   : > { %569 = vst.msk [vmem:[#allocation4] sm:$0xff] %vm479_vm0, %v568_v31 }
 0x350   : > { %v720_v32 = vpop.permute.xlu2 %719 }
 0x351   : > { %v1322_v33 = vpop.eup %1321  ;;  %v722_v46 = vmul.f32 %v720_v32, %v716_v45  ;;  %v1299_v32 = vld [vmem:[#allocation7] ss:$0 sm:$0xff] }
 0x352   : > { %950 = vperm.xlu1 %1297, %v1322_v33  }
 0x354   : > { %v845_v35 = vld [vmem:[#allocation4] sm:$0xff] }
 0x355   : > { %v853_v36 = vmul.f32 %v851_v34, %v845_v35  ;;  %v1300_v34 = vld [vmem:[#allocation9] ss:$0 sm:$0xff] }
 0x357   : > { %1207 = vmatmul.msk.f32.vlgmr.msra.gmra.mxu3 %vm479_vm0, %v853_v36 }
 0x358   : > { %v861_v38 = vpop.permute.xlu2 %860 }
 0x359   : > { %v863_v39 = vmul.f32 %v861_v38, %v855_v37 }
 0x35b   : > { %1206 = vmatmul.msk.f32.vlgmr.msra.gmra.mxu1 %vm479_vm0, %v863_v39 }
 0x376   : > { %v712_v43 = vpop.xlane.xlu1 %711 }
 0x377   : > { %v713_v41 = vadd.f32 %v712_v43, %v709_v42 }
 0x379   : > { %714 = vst.msk [vmem:[#allocation3 + $0x10] sm:$0xff] %vm470_vm1, %v713_v41 }
 0x380   : > { %v912_v44 = vld [vmem:[#allocation3 + $0x10] sm:$0xff] }
 0x381   : > { %1323 = vrcp.f32 %v912_v44 }
 0x382   : > { %1325 = vrcp.f32 %v1483_v11 }
 0x385   : > { %v746_v47 = vpop.f32.mrf.mxu3 }
 0x386   : > { %v749_v48 = vadd.f32 %v746_v47, %v722_v46 }
 0x387   : > { %v1324_v49 = vpop.eup %1323 }
 0x388   : > { %750 = vst.msk [vmem:[#allocation4 + $0x10] sm:$0xff] %vm479_vm0, %v749_v48  ;;  %916 = vperm.xlu0 %1295, %v1324_v49   ;;  %v1326_v12 = vpop.eup %1325 }
 0x389   : > { %v991_v13 = vmul.f32 32.0, %v1326_v12  ;;  %vm995_vm3 = vweird.f32 %v1326_v12 }
 0x38b   : > { %v992_v14 = vsub.f32 1.0, %v991_v13 }
 0x38d   : > { %v993_v15 = vmul.f32 %v1326_v12, %v992_v14 }
 0x38e   : > { %v810_v51 = vpop.permute.xlu1 %809 }
 0x38f   : > { %v812_v52 = vmul.f32 %v810_v51, %v806_v50  ;;  %v911_v60 = vld [vmem:[#allocation4 + $0x10] sm:$0xff]  ;;  %v994_v16 = vadd.f32 %v1326_v12, %v993_v15 }
 0x391   : > { %v839_v54 = vadd.f32 %v836_v53, %v812_v52  ;;  %v996_v17 = vsel %vm995_vm3, %v1326_v12, %v994_v16 }
 0x393   : > { %840 = vst.msk [vmem:[#allocation4 + $0x18] sm:$0xff] %vm479_vm0, %v839_v54 }
 0x39a   : > { %v945_v57 = vld [vmem:[#allocation4 + $0x18] sm:$0xff] }
 0x3c4   : > { %v951_v58 = vpop.permute.xlu1 %950 }
 0x3c5   : > { %v953_v59 = vmul.f32 %v951_v58, %v945_v57 }
 0x3c7   : > { %1209 = vmatmul.msk.f32.vlgmr.msra.gmra.mxu2 %vm479_vm0, %v953_v59 }
 0x3d8   : > { %v885_v0 = vpop.f32.mrf.mxu1 }
 0x3da   : > { %v908_v63 = vpop.f32.mrf.mxu3 }
 0x3db   : > { %v909_v1 = vadd.f32 %v908_v63, %v885_v0 }
 0x3fa   : > { %v917_v61 = vpop.permute.xlu0 %916 }
 0x3fb   : > { %v919_v62 = vmul.f32 %v917_v61, %v911_v60 }
 0x3fd   : > { %1208 = vmatmul.msk.f32.vlgmr.msra.gmra.mxu0 %vm479_vm0, %v919_v62 }
 0x44a   : > { %v975_v5 = vpop.f32.mrf.mxu2 }
 0x47a   : > { %v941_v2 = vpop.f32.mrf.mxu0 }
 0x47b   : > { %v944_v3 = vadd.f32 %v941_v2, %v909_v1 }
 0x47d   : > { %v978_v6 = vadd.f32 %v975_v5, %v944_v3 }
 0x47f   : > { %v983_v8 = vadd.f32 %v1298_v4, %v978_v6 }
 0x481   : > { %v985_v9 = vadd.f32 %v984_v7, %v983_v8 }
 0x483   : > { %v987_v10 = vsel %vm986_vm2, %v985_v9, 0.0 }
 0x484   : > { %988 = vadd.xlane.f32.xlu1 %v987_v10 }
 0x4f7   : > { %v989_v18 = vpop.xlane.xlu1 %988 }
 0x4f8   : > { %v997_v19 = vmul.f32 %v996_v17, %v989_v18 }
 0x4fa   : > { %v998_v20 = vsub.f32 %v985_v9, %v997_v19 }
 0x4fc   : > { %v999_v21 = vmul.f32 %v998_v20, %v998_v20 }
 0x4fe   : > { %v1000_v22 = vsel %vm986_vm2, %v999_v21, 0.0 }
 0x4ff   : > { %1001 = vadd.xlane.f32.xlu2 %v1000_v22 }
 0x572   : > { %v1002_v23 = vpop.xlane.xlu2 %1001 }
 0x573   : > { %v1003_v24 = vmul.f32 %v1002_v23, %v996_v17 }
 0x575   : > { %v1004_v25 = vadd.f32 1e-05, %v1003_v24 }
 0x577   : > { %1327 = vrsqrt.f32 %v1004_v25  ;;  %vm1011_vm5 = vweird.f32 %v1004_v25 }
 0x57d   : > { %v1328_v26 = vpop.eup %1327 }
 0x57e   : > { %v1006_v27 = vmul.f32 %v1328_v26, %v1004_v25  ;;  %vm1012_vm4 = vweird.f32 %v1328_v26 }
 0x57f   : > { %vm1013_vm6 = vmor %vm1011_vm5, %vm1012_vm4 }
 0x580   : > { %v1007_v28 = vmul.f32 %v1328_v26, %v1006_v27 }
 0x582   : > { %v1008_v29 = vmul.f32 0.5, %v1007_v28 }
 0x584   : > { %v1009_v30 = vsub.f32 1.5, %v1008_v29 }
 0x586   : > { %v1010_v31 = vmul.f32 %v1328_v26, %v1009_v30 }
 0x588   : > { %v1014_v33 = vsel %vm1013_vm6, %v1328_v26, %v1010_v31 }
 0x589   : > { %v1015_v35 = vmul.f32 %v1014_v33, %v998_v20 }
 0x58b   : > { %v1020_v36 = vmul.f32 %v1299_v32, %v1015_v35 }
 0x58d   : > { %v1025_v37 = vadd.f32 %v1300_v34, %v1020_v36 }
 0x58f   : > { %1026 = vst.msk [vmem:[%s465_s21] sm:$0xff] %vm986_vm2, %v1025_v37 }
 0x590 PF: > { %s22_s10 = sadd.s32 1, %s1473_s10   ;;  %s1776_s27 = smov %s1457_s28 }
 0x591   : > { %p19_p1 = scmp.ge.s32.totalorder %s22_s10, 4   ;;  %s1777_s28 = smov %s1461_s29 }
 0x592   : > { %s1778_s29 = smov %s1602_s18  ;;  %s1779_s30 = smov %s1469_s9 }
 0x593   : > { %s1780_s9 = smov %s1782_s25  ;;  %21 = sbr.rel (!%p19_p1) target bundleno = 7 (0x7), region = 126 }
 0x598   :  { %1052 = vsyncpa [#allocation6], 1 }
 0x599   :  { %1054 = vsyncpa [#allocation6 + $0x1], 1 }
 0x59a   :  { %1055 = vsyncpa [#allocation8], 1 }

</bundles_post_ra>
